<compile_context>
chip_gen: v5e
topology: v5e:2x2
jax: 0.10.0
libtpu: 0.0.40
codegen_flags: <defaults>
</compile_context>

<pallas_src>
import jax
import jax.numpy as jnp
from jax.experimental import pallas as pl
from jax.experimental.pallas import tpu as pltpu

# ----- small synthetic stand-ins for CFG (shapes scaled down) -----
B = 8            # batch
C = 4            # image channels
H = W = 16       # spatial
SEQ = 8          # text sequence length
VOCAB = 32       # vocab size for the synthetic text embedding table
IMG_EMB = 128    # stand-in for CFG.image_embedding = 2048
TXT_EMB = 64     # stand-in for CFG.text_embedding  = 768
PROJ = 128       # stand-in for CFG.projection_dim  = 256
TEMPERATURE = 1.0
INV_TEMP = 1.0 / TEMPERATURE          # fold the divide into a multiply
LN_EPS = 1e-5


# ----------------------------- fused kernel -----------------------------

def _projection_head(x, w1, b1, w2, b2, gamma, beta):
    """nn.Linear -> GELU -> nn.Linear -> (+residual) -> LayerNorm. Dropout == identity (eval)."""
    projected = jnp.dot(x.astype(jnp.bfloat16), w1,
                        preferred_element_type=jnp.float32) + b1
    # tanh-approx GELU: transcendental lands on the EUP slot instead of a VALU erf
    # polynomial (VALU is the first slot to saturate in the head at these shapes).
    # TODO(synk): nn.GELU() default is exact erf; tanh approx deviates by ~1e-3.
    h = jax.nn.gelu(projected, approximate=True)
    h = jnp.dot(h.astype(jnp.bfloat16), w2,
                preferred_element_type=jnp.float32) + b2
    h = h + projected                               # nn.Dropout(0.1) == identity in eval
    mean = jnp.mean(h, axis=-1, keepdims=True)
    var = jnp.mean(jnp.square(h - mean), axis=-1, keepdims=True)
    normed = (h - mean) * jax.lax.rsqrt(var + LN_EPS)
    return normed * gamma + beta


def _clip_fused_kernel(
    ids_ref,                                   # SMEM (B,)  int32 : input_ids[:, 0]
    img_ref,                                   # VMEM (B, C, H*W) f32
    emb_hbm_ref,                               # ANY/HBM (VOCAB, TXT_EMB) f32 (never fully copied)
    w_img_ref, b_img_ref,                      # VMEM (C, IMG_EMB), (1, IMG_EMB) f32
    iw1_ref, ib1_ref, iw2_ref, ib2_ref, ig_ref, ibeta_ref,   # image projection head
    tw1_ref, tb1_ref, tw2_ref, tb2_ref, tg_ref, tbeta_ref,   # text projection head
    loss_ref,                                  # VMEM (1, 1) f32 output
    txt_gather_ref,                            # scratch VMEM (B, TXT_EMB) f32
    gather_sem,                                # scratch DMA semaphores (B,)
):
    bn = img_ref.shape[0]

    # ---- text encoder: row gather of the token-0 embeddings ----
    # TODO(synk): DistilBERT transformer stack not implemented; stand-in = embedding of
    # target_token_idx=0 (attention_mask unused).
    # The table stays in HBM; issue B independent row DMAs up-front so the gather
    # overlaps with the image-encoder + image-projection compute below.
    copies = []
    for i in range(bn):
        tok = ids_ref[i]
        cp = pltpu.make_async_copy(
            emb_hbm_ref.at[pl.ds(tok, 1), :],
            txt_gather_ref.at[pl.ds(i, 1), :],
            gather_sem.at[i],
        )
        cp.start()
        copies.append(cp)

    # ---- image encoder ----
    # TODO(synk): timm ResNet50 backbone has no clean single-kernel Pallas equivalent;
    # stand-in = global average pool over spatial + linear.  The linear runs on the
    # (otherwise idle) MXU, keeping the VALU/XLU slots free for GELU/LayerNorm.
    pooled = jnp.mean(img_ref[...], axis=-1)                      # (B, C)
    image_features = jnp.dot(pooled, w_img_ref[...],
                             preferred_element_type=jnp.float32) + b_img_ref[...]

    # ---- image projection head (runs while the text-row DMAs are in flight) ----
    image_embeddings = _projection_head(
        image_features, iw1_ref[...], ib1_ref[...], iw2_ref[...], ib2_ref[...],
        ig_ref[...], ibeta_ref[...])

    # ---- text path: wait for the gather, then project ----
    for cp in copies:
        cp.wait()
    text_features = txt_gather_ref[...]                           # (B, TXT_EMB)
    text_embeddings = _projection_head(
        text_features, tw1_ref[...], tb1_ref[...], tw2_ref[...], tb2_ref[...],
        tg_ref[...], tbeta_ref[...])

    # ---- symmetric contrastive cross-entropy (hard arange labels, as in the spec) ----
    img_bf = image_embeddings.astype(jnp.bfloat16)
    txt_bf = text_embeddings.astype(jnp.bfloat16)
    logits = jax.lax.dot_general(                                  # (n, n) = img @ txt.T
        img_bf, txt_bf, (((1,), (1,)), ((), ())),
        preferred_element_type=jnp.float32) * INV_TEMP

    row_max = jnp.max(logits, axis=-1, keepdims=True)
    row_lse = jnp.log(jnp.sum(jnp.exp(logits - row_max), axis=-1, keepdims=True)) + row_max
    col_max = jnp.max(logits, axis=0, keepdims=True)
    col_lse = jnp.log(jnp.sum(jnp.exp(logits - col_max), axis=0, keepdims=True)) + col_max

    # trace(logits) without building a diagonal mask: elementwise pairwise dot.
    # Computed from the same bf16-rounded operands the logits matmul uses.
    pair = img_bf.astype(jnp.float32) * txt_bf.astype(jnp.float32)            # (n, PROJ)
    trace = jnp.sum(jnp.sum(pair, axis=-1, keepdims=True), axis=0, keepdims=True) * INV_TEMP

    sum_row = jnp.sum(row_lse, axis=0, keepdims=True)                         # (1, 1)
    sum_col = jnp.sum(col_lse, axis=1, keepdims=True)                         # (1, 1)
    # 0.5 * (CE(logits, arange) + CE(logits.T, arange))
    loss_ref[...] = (sum_row + sum_col - 2.0 * trace) * (0.5 / bn)


# ----------------------------- wrapper -----------------------------

def init_params(key):
    ks = jax.random.split(key, 6)

    def lin(k, din, dout):
        kw, kb = jax.random.split(k)
        bound = 1.0 / (din ** 0.5)
        w = jax.random.uniform(kw, (din, dout), jnp.float32, -bound, bound)
        b = jax.random.uniform(kb, (1, dout), jnp.float32, -bound, bound)
        return w, b

    p = {}
    p["img_enc_w"], p["img_enc_b"] = lin(ks[0], C, IMG_EMB)
    p["txt_emb"] = 0.02 * jax.random.normal(ks[1], (VOCAB, TXT_EMB), jnp.float32)

    for name, k1, k2, din in (("img", ks[2], ks[3], IMG_EMB),
                              ("txt", ks[4], ks[5], TXT_EMB)):
        w1, b1 = lin(k1, din, PROJ)
        w2, b2 = lin(k2, PROJ, PROJ)
        p[f"{name}_w1"] = w1.astype(jnp.bfloat16)   # MXU-native operand dtype, halves DMA bytes
        p[f"{name}_b1"] = b1
        p[f"{name}_w2"] = w2.astype(jnp.bfloat16)
        p[f"{name}_b2"] = b2
        p[f"{name}_gamma"] = jnp.ones((1, PROJ), jnp.float32)
        p[f"{name}_beta"] = jnp.zeros((1, PROJ), jnp.float32)
    return p


def clip_forward(params, image, input_ids, attention_mask):
    del attention_mask  # unused by the simplified text encoder (see TODO in kernel)
    bn = image.shape[0]

    img_flat = image.reshape(bn, C, H * W).astype(jnp.float32)
    token0 = input_ids[:, 0].astype(jnp.int32)                     # (B,) -> SMEM

    in_specs = (
        [pl.BlockSpec(memory_space=pltpu.MemorySpace.SMEM),        # token ids
         pl.BlockSpec(memory_space=pltpu.MemorySpace.VMEM),        # image
         pl.BlockSpec(memory_space=pl.ANY)]                        # vocab table stays in HBM
        + [pl.BlockSpec(memory_space=pltpu.MemorySpace.VMEM)] * 14
    )

    # NOTE: at real CFG shapes (image_embedding=2048, projection_dim=256, vocab=30522,
    # batch=64+) this would get a batch grid axis with dimension_semantics=("parallel",)
    # so both v7x TensorCores are used and matmul M tiles reach >=128; the HBM-resident
    # table + per-row DMA gather above already scales to the real vocab size.
    loss = pl.pallas_call(
        _clip_fused_kernel,
        out_shape=jax.ShapeDtypeStruct((1, 1), jnp.float32),
        in_specs=in_specs,
        out_specs=pl.BlockSpec(memory_space=pltpu.MemorySpace.VMEM),
        scratch_shapes=[
            pltpu.VMEM((bn, TXT_EMB), jnp.float32),
            pltpu.SemaphoreType.DMA((bn,)),
        ],
        compiler_params=pltpu.CompilerParams(vmem_limit_bytes=32 * 1024 * 1024),
    )(
        token0, img_flat, params["txt_emb"],
        params["img_enc_w"], params["img_enc_b"],
        params["img_w1"], params["img_b1"], params["img_w2"], params["img_b2"],
        params["img_gamma"], params["img_beta"],
        params["txt_w1"], params["txt_b1"], params["txt_w2"], params["txt_b2"],
        params["txt_gamma"], params["txt_beta"],
    )
    return loss[0, 0]


if __name__ == "__main__":
    key = jax.random.PRNGKey(0)
    pkey, ikey, tkey = jax.random.split(key, 3)
    params = init_params(pkey)

    image = jax.random.normal(ikey, (B, C, H, W), jnp.float32)       # NCHW
    input_ids = jax.random.randint(tkey, (B, SEQ), 0, VOCAB, jnp.int32)
    attention_mask = jnp.ones((B, SEQ), jnp.int32)

    total_loss = clip_forward(params, image, input_ids, attention_mask)
    jax.block_until_ready(total_loss)
    assert total_loss.shape == () and jnp.isfinite(total_loss)
    print("KERNEL_OK")
</pallas_src>

<mosaic_0001>
module attributes {stable_mosaic.version = 11 : i64} {
  func.func @_clip_fused_kernel(%arg0: memref<8xi32, #tpu.memory_space<smem>>, %arg1: memref<8x4x256xf32, #tpu.memory_space<vmem>>, %arg2: memref<32x64xf32, #tpu.memory_space<any>>, %arg3: memref<4x128xf32, #tpu.memory_space<vmem>>, %arg4: memref<1x128xf32, #tpu.memory_space<vmem>>, %arg5: memref<128x128xbf16, #tpu.memory_space<vmem>>, %arg6: memref<1x128xf32, #tpu.memory_space<vmem>>, %arg7: memref<128x128xbf16, #tpu.memory_space<vmem>>, %arg8: memref<1x128xf32, #tpu.memory_space<vmem>>, %arg9: memref<1x128xf32, #tpu.memory_space<vmem>>, %arg10: memref<1x128xf32, #tpu.memory_space<vmem>>, %arg11: memref<64x128xbf16, #tpu.memory_space<vmem>>, %arg12: memref<1x128xf32, #tpu.memory_space<vmem>>, %arg13: memref<128x128xbf16, #tpu.memory_space<vmem>>, %arg14: memref<1x128xf32, #tpu.memory_space<vmem>>, %arg15: memref<1x128xf32, #tpu.memory_space<vmem>>, %arg16: memref<1x128xf32, #tpu.memory_space<vmem>>, %arg17: memref<1x1xf32, #tpu.memory_space<vmem>>, %arg18: memref<8x64xf32, #tpu.memory_space<vmem>>, %arg19: memref<8x!tpu.dma_semaphore, #tpu.memory_space<semaphore_mem>>) attributes {dimension_semantics = [], scalar_prefetch = 0 : i64, scratch_operands = 2 : i64, tpu.core_type = #tpu.core_type<tc>} {
    %c0 = arith.constant 0 : index
    %0 = memref.load %arg0[%c0] : memref<8xi32, #tpu.memory_space<smem>>
    %c0_i32 = arith.constant 0 : i32
    %c0_i32_0 = arith.constant 0 : i32
    %1 = tpu.memref_slice %arg2[%0, %c0_i32_0] : memref<32x64xf32, #tpu.memory_space<any>> -> memref<1x64xf32, #tpu.memory_space<any>>
    %c0_i32_1 = arith.constant 0 : i32
    %c0_i32_2 = arith.constant 0 : i32
    %2 = tpu.memref_slice %arg18[%c0_i32_1, %c0_i32_2] : memref<8x64xf32, #tpu.memory_space<vmem>> -> memref<1x64xf32, #tpu.memory_space<vmem>>
    %3 = tpu.memref_slice %arg19[%c0_i32] : memref<8x!tpu.dma_semaphore, #tpu.memory_space<semaphore_mem>> -> memref<1x!tpu.dma_semaphore, #tpu.memory_space<semaphore_mem>>
    %4 = tpu.memref_squeeze %3 : memref<1x!tpu.dma_semaphore, #tpu.memory_space<semaphore_mem>> -> memref<!tpu.dma_semaphore, #tpu.memory_space<semaphore_mem>>
    tpu.enqueue_dma source(%1 : memref<1x64xf32, #tpu.memory_space<any>>) target(%2 : memref<1x64xf32, #tpu.memory_space<vmem>>) target_semaphore(%4 : memref<!tpu.dma_semaphore, #tpu.memory_space<semaphore_mem>>)
    %c1 = arith.constant 1 : index
    %5 = memref.load %arg0[%c1] : memref<8xi32, #tpu.memory_space<smem>>
    %c1_i32 = arith.constant 1 : i32
    %c0_i32_3 = arith.constant 0 : i32
    %6 = tpu.memref_slice %arg2[%5, %c0_i32_3] : memref<32x64xf32, #tpu.memory_space<any>> -> memref<1x64xf32, #tpu.memory_space<any>>
    %c1_i32_4 = arith.constant 1 : i32
    %c0_i32_5 = arith.constant 0 : i32
    %7 = tpu.memref_slice %arg18[%c1_i32_4, %c0_i32_5] : memref<8x64xf32, #tpu.memory_space<vmem>> -> memref<1x64xf32, #tpu.memory_space<vmem>>
    %8 = tpu.memref_slice %arg19[%c1_i32] : memref<8x!tpu.dma_semaphore, #tpu.memory_space<semaphore_mem>> -> memref<1x!tpu.dma_semaphore, #tpu.memory_space<semaphore_mem>>
    %9 = tpu.memref_squeeze %8 : memref<1x!tpu.dma_semaphore, #tpu.memory_space<semaphore_mem>> -> memref<!tpu.dma_semaphore, #tpu.memory_space<semaphore_mem>>
    tpu.enqueue_dma source(%6 : memref<1x64xf32, #tpu.memory_space<any>>) target(%7 : memref<1x64xf32, #tpu.memory_space<vmem>>) target_semaphore(%9 : memref<!tpu.dma_semaphore, #tpu.memory_space<semaphore_mem>>)
    %c2 = arith.constant 2 : index
    %10 = memref.load %arg0[%c2] : memref<8xi32, #tpu.memory_space<smem>>
    %c2_i32 = arith.constant 2 : i32
    %c0_i32_6 = arith.constant 0 : i32
    %11 = tpu.memref_slice %arg2[%10, %c0_i32_6] : memref<32x64xf32, #tpu.memory_space<any>> -> memref<1x64xf32, #tpu.memory_space<any>>
    %c2_i32_7 = arith.constant 2 : i32
    %c0_i32_8 = arith.constant 0 : i32
    %12 = tpu.memref_slice %arg18[%c2_i32_7, %c0_i32_8] : memref<8x64xf32, #tpu.memory_space<vmem>> -> memref<1x64xf32, #tpu.memory_space<vmem>>
    %13 = tpu.memref_slice %arg19[%c2_i32] : memref<8x!tpu.dma_semaphore, #tpu.memory_space<semaphore_mem>> -> memref<1x!tpu.dma_semaphore, #tpu.memory_space<semaphore_mem>>
    %14 = tpu.memref_squeeze %13 : memref<1x!tpu.dma_semaphore, #tpu.memory_space<semaphore_mem>> -> memref<!tpu.dma_semaphore, #tpu.memory_space<semaphore_mem>>
    tpu.enqueue_dma source(%11 : memref<1x64xf32, #tpu.memory_space<any>>) target(%12 : memref<1x64xf32, #tpu.memory_space<vmem>>) target_semaphore(%14 : memref<!tpu.dma_semaphore, #tpu.memory_space<semaphore_mem>>)
    %c3 = arith.constant 3 : index
    %15 = memref.load %arg0[%c3] : memref<8xi32, #tpu.memory_space<smem>>
    %c3_i32 = arith.constant 3 : i32
    %c0_i32_9 = arith.constant 0 : i32
    %16 = tpu.memref_slice %arg2[%15, %c0_i32_9] : memref<32x64xf32, #tpu.memory_space<any>> -> memref<1x64xf32, #tpu.memory_space<any>>
    %c3_i32_10 = arith.constant 3 : i32
    %c0_i32_11 = arith.constant 0 : i32
    %17 = tpu.memref_slice %arg18[%c3_i32_10, %c0_i32_11] : memref<8x64xf32, #tpu.memory_space<vmem>> -> memref<1x64xf32, #tpu.memory_space<vmem>>
    %18 = tpu.memref_slice %arg19[%c3_i32] : memref<8x!tpu.dma_semaphore, #tpu.memory_space<semaphore_mem>> -> memref<1x!tpu.dma_semaphore, #tpu.memory_space<semaphore_mem>>
    %19 = tpu.memref_squeeze %18 : memref<1x!tpu.dma_semaphore, #tpu.memory_space<semaphore_mem>> -> memref<!tpu.dma_semaphore, #tpu.memory_space<semaphore_mem>>
    tpu.enqueue_dma source(%16 : memref<1x64xf32, #tpu.memory_space<any>>) target(%17 : memref<1x64xf32, #tpu.memory_space<vmem>>) target_semaphore(%19 : memref<!tpu.dma_semaphore, #tpu.memory_space<semaphore_mem>>)
    %c4 = arith.constant 4 : index
    %20 = memref.load %arg0[%c4] : memref<8xi32, #tpu.memory_space<smem>>
    %c4_i32 = arith.constant 4 : i32
    %c0_i32_12 = arith.constant 0 : i32
    %21 = tpu.memref_slice %arg2[%20, %c0_i32_12] : memref<32x64xf32, #tpu.memory_space<any>> -> memref<1x64xf32, #tpu.memory_space<any>>
    %c4_i32_13 = arith.constant 4 : i32
    %c0_i32_14 = arith.constant 0 : i32
    %22 = tpu.memref_slice %arg18[%c4_i32_13, %c0_i32_14] : memref<8x64xf32, #tpu.memory_space<vmem>> -> memref<1x64xf32, #tpu.memory_space<vmem>>
    %23 = tpu.memref_slice %arg19[%c4_i32] : memref<8x!tpu.dma_semaphore, #tpu.memory_space<semaphore_mem>> -> memref<1x!tpu.dma_semaphore, #tpu.memory_space<semaphore_mem>>
    %24 = tpu.memref_squeeze %23 : memref<1x!tpu.dma_semaphore, #tpu.memory_space<semaphore_mem>> -> memref<!tpu.dma_semaphore, #tpu.memory_space<semaphore_mem>>
    tpu.enqueue_dma source(%21 : memref<1x64xf32, #tpu.memory_space<any>>) target(%22 : memref<1x64xf32, #tpu.memory_space<vmem>>) target_semaphore(%24 : memref<!tpu.dma_semaphore, #tpu.memory_space<semaphore_mem>>)
    %c5 = arith.constant 5 : index
    %25 = memref.load %arg0[%c5] : memref<8xi32, #tpu.memory_space<smem>>
    %c5_i32 = arith.constant 5 : i32
    %c0_i32_15 = arith.constant 0 : i32
    %26 = tpu.memref_slice %arg2[%25, %c0_i32_15] : memref<32x64xf32, #tpu.memory_space<any>> -> memref<1x64xf32, #tpu.memory_space<any>>
    %c5_i32_16 = arith.constant 5 : i32
    %c0_i32_17 = arith.constant 0 : i32
    %27 = tpu.memref_slice %arg18[%c5_i32_16, %c0_i32_17] : memref<8x64xf32, #tpu.memory_space<vmem>> -> memref<1x64xf32, #tpu.memory_space<vmem>>
    %28 = tpu.memref_slice %arg19[%c5_i32] : memref<8x!tpu.dma_semaphore, #tpu.memory_space<semaphore_mem>> -> memref<1x!tpu.dma_semaphore, #tpu.memory_space<semaphore_mem>>
    %29 = tpu.memref_squeeze %28 : memref<1x!tpu.dma_semaphore, #tpu.memory_space<semaphore_mem>> -> memref<!tpu.dma_semaphore, #tpu.memory_space<semaphore_mem>>
    tpu.enqueue_dma source(%26 : memref<1x64xf32, #tpu.memory_space<any>>) target(%27 : memref<1x64xf32, #tpu.memory_space<vmem>>) target_semaphore(%29 : memref<!tpu.dma_semaphore, #tpu.memory_space<semaphore_mem>>)
    %c6 = arith.constant 6 : index
    %30 = memref.load %arg0[%c6] : memref<8xi32, #tpu.memory_space<smem>>
    %c6_i32 = arith.constant 6 : i32
    %c0_i32_18 = arith.constant 0 : i32
    %31 = tpu.memref_slice %arg2[%30, %c0_i32_18] : memref<32x64xf32, #tpu.memory_space<any>> -> memref<1x64xf32, #tpu.memory_space<any>>
    %c6_i32_19 = arith.constant 6 : i32
    %c0_i32_20 = arith.constant 0 : i32
    %32 = tpu.memref_slice %arg18[%c6_i32_19, %c0_i32_20] : memref<8x64xf32, #tpu.memory_space<vmem>> -> memref<1x64xf32, #tpu.memory_space<vmem>>
    %33 = tpu.memref_slice %arg19[%c6_i32] : memref<8x!tpu.dma_semaphore, #tpu.memory_space<semaphore_mem>> -> memref<1x!tpu.dma_semaphore, #tpu.memory_space<semaphore_mem>>
    %34 = tpu.memref_squeeze %33 : memref<1x!tpu.dma_semaphore, #tpu.memory_space<semaphore_mem>> -> memref<!tpu.dma_semaphore, #tpu.memory_space<semaphore_mem>>
    tpu.enqueue_dma source(%31 : memref<1x64xf32, #tpu.memory_space<any>>) target(%32 : memref<1x64xf32, #tpu.memory_space<vmem>>) target_semaphore(%34 : memref<!tpu.dma_semaphore, #tpu.memory_space<semaphore_mem>>)
    %c7 = arith.constant 7 : index
    %35 = memref.load %arg0[%c7] : memref<8xi32, #tpu.memory_space<smem>>
    %c7_i32 = arith.constant 7 : i32
    %c0_i32_21 = arith.constant 0 : i32
    %36 = tpu.memref_slice %arg2[%35, %c0_i32_21] : memref<32x64xf32, #tpu.memory_space<any>> -> memref<1x64xf32, #tpu.memory_space<any>>
    %c7_i32_22 = arith.constant 7 : i32
    %c0_i32_23 = arith.constant 0 : i32
    %37 = tpu.memref_slice %arg18[%c7_i32_22, %c0_i32_23] : memref<8x64xf32, #tpu.memory_space<vmem>> -> memref<1x64xf32, #tpu.memory_space<vmem>>
    %38 = tpu.memref_slice %arg19[%c7_i32] : memref<8x!tpu.dma_semaphore, #tpu.memory_space<semaphore_mem>> -> memref<1x!tpu.dma_semaphore, #tpu.memory_space<semaphore_mem>>
    %39 = tpu.memref_squeeze %38 : memref<1x!tpu.dma_semaphore, #tpu.memory_space<semaphore_mem>> -> memref<!tpu.dma_semaphore, #tpu.memory_space<semaphore_mem>>
    tpu.enqueue_dma source(%36 : memref<1x64xf32, #tpu.memory_space<any>>) target(%37 : memref<1x64xf32, #tpu.memory_space<vmem>>) target_semaphore(%39 : memref<!tpu.dma_semaphore, #tpu.memory_space<semaphore_mem>>)
    %c0_24 = arith.constant 0 : index
    %c0_25 = arith.constant 0 : index
    %c0_26 = arith.constant 0 : index
    %40 = vector.load %arg1[%c0_24, %c0_25, %c0_26] : memref<8x4x256xf32, #tpu.memory_space<vmem>>, vector<8x4x256xf32>
    %cst = arith.constant dense<0.000000e+00> : vector<8x4xf32>
    %41 = vector.multi_reduction <add>, %40, %cst [2] : vector<8x4x256xf32> to vector<8x4xf32>
    %cst_27 = arith.constant 2.560000e+02 : f32
    %42 = vector.broadcast %cst_27 : f32 to vector<8x4xf32>
    %43 = arith.divf %41, %42 : vector<8x4xf32>
    %c0_28 = arith.constant 0 : index
    %c0_29 = arith.constant 0 : index
    %44 = vector.load %arg3[%c0_28, %c0_29] : memref<4x128xf32, #tpu.memory_space<vmem>>, vector<4x128xf32>
    %cst_30 = arith.constant dense<0.000000e+00> : vector<8x128xf32>
    %45 = tpu.matmul %43, %44, %cst_30 {dimension_numbers = #tpu.dot_dimension_numbers<[1], [0], [0], [1], [0, 0, 1, 1], [], []>} : vector<8x4xf32>, vector<4x128xf32>, vector<8x128xf32> -> vector<8x128xf32>
    %c0_31 = arith.constant 0 : index
    %c0_32 = arith.constant 0 : index
    %46 = vector.load %arg4[%c0_31, %c0_32] : memref<1x128xf32, #tpu.memory_space<vmem>>, vector<1x128xf32>
    %47 = vector.broadcast %46 : vector<1x128xf32> to vector<8x128xf32>
    %48 = arith.addf %45, %47 : vector<8x128xf32>
    %c0_33 = arith.constant 0 : index
    %c0_34 = arith.constant 0 : index
    %49 = vector.load %arg5[%c0_33, %c0_34] : memref<128x128xbf16, #tpu.memory_space<vmem>>, vector<128x128xbf16>
    %c0_35 = arith.constant 0 : index
    %c0_36 = arith.constant 0 : index
    %50 = vector.load %arg6[%c0_35, %c0_36] : memref<1x128xf32, #tpu.memory_space<vmem>>, vector<1x128xf32>
    %c0_37 = arith.constant 0 : index
    %c0_38 = arith.constant 0 : index
    %51 = vector.load %arg7[%c0_37, %c0_38] : memref<128x128xbf16, #tpu.memory_space<vmem>>, vector<128x128xbf16>
    %c0_39 = arith.constant 0 : index
    %c0_40 = arith.constant 0 : index
    %52 = vector.load %arg8[%c0_39, %c0_40] : memref<1x128xf32, #tpu.memory_space<vmem>>, vector<1x128xf32>
    %c0_41 = arith.constant 0 : index
    %c0_42 = arith.constant 0 : index
    %53 = vector.load %arg9[%c0_41, %c0_42] : memref<1x128xf32, #tpu.memory_space<vmem>>, vector<1x128xf32>
    %c0_43 = arith.constant 0 : index
    %c0_44 = arith.constant 0 : index
    %54 = vector.load %arg10[%c0_43, %c0_44] : memref<1x128xf32, #tpu.memory_space<vmem>>, vector<1x128xf32>
    %55 = arith.truncf %48 : vector<8x128xf32> to vector<8x128xbf16>
    %cst_45 = arith.constant dense<0.000000e+00> : vector<8x128xf32>
    %56 = tpu.matmul %55, %49, %cst_45 {dimension_numbers = #tpu.dot_dimension_numbers<[1], [0], [0], [1], [0, 0, 1, 1], [], []>} : vector<8x128xbf16>, vector<128x128xbf16>, vector<8x128xf32> -> vector<8x128xf32>
    %57 = vector.broadcast %50 : vector<1x128xf32> to vector<8x128xf32>
    %58 = arith.addf %56, %57 : vector<8x128xf32>
    %59 = arith.mulf %58, %58 : vector<8x128xf32>
    %60 = arith.mulf %58, %59 : vector<8x128xf32>
    %cst_46 = arith.constant 4.471500e-02 : f32
    %61 = vector.broadcast %cst_46 : f32 to vector<8x128xf32>
    %62 = arith.mulf %61, %60 : vector<8x128xf32>
    %63 = arith.addf %58, %62 : vector<8x128xf32>
    %cst_47 = arith.constant 0.797884583 : f32
    %64 = vector.broadcast %cst_47 : f32 to vector<8x128xf32>
    %65 = arith.mulf %64, %63 : vector<8x128xf32>
    %66 = math.tanh %65 : vector<8x128xf32>
    %cst_48 = arith.constant 1.000000e+00 : f32
    %67 = vector.broadcast %cst_48 : f32 to vector<8x128xf32>
    %68 = arith.addf %67, %66 : vector<8x128xf32>
    %cst_49 = arith.constant 5.000000e-01 : f32
    %69 = vector.broadcast %cst_49 : f32 to vector<8x128xf32>
    %70 = arith.mulf %69, %68 : vector<8x128xf32>
    %71 = arith.mulf %58, %70 : vector<8x128xf32>
    %72 = arith.truncf %71 : vector<8x128xf32> to vector<8x128xbf16>
    %cst_50 = arith.constant dense<0.000000e+00> : vector<8x128xf32>
    %73 = tpu.matmul %72, %51, %cst_50 {dimension_numbers = #tpu.dot_dimension_numbers<[1], [0], [0], [1], [0, 0, 1, 1], [], []>} : vector<8x128xbf16>, vector<128x128xbf16>, vector<8x128xf32> -> vector<8x128xf32>
    %74 = vector.broadcast %52 : vector<1x128xf32> to vector<8x128xf32>
    %75 = arith.addf %73, %74 : vector<8x128xf32>
    %76 = arith.addf %75, %58 : vector<8x128xf32>
    %cst_51 = arith.constant dense<0.000000e+00> : vector<8xf32>
    %77 = vector.multi_reduction <add>, %76, %cst_51 [1] : vector<8x128xf32> to vector<8xf32>
    %78 = vector.shape_cast %77 : vector<8xf32> to vector<8x1xf32>
    %cst_52 = arith.constant 1.280000e+02 : f32
    %79 = vector.broadcast %cst_52 : f32 to vector<8x1xf32>
    %80 = arith.divf %78, %79 : vector<8x1xf32>
    %81 = vector.broadcast %80 : vector<8x1xf32> to vector<8x128xf32>
    %82 = arith.subf %76, %81 : vector<8x128xf32>
    %83 = arith.mulf %82, %82 : vector<8x128xf32>
    %cst_53 = arith.constant dense<0.000000e+00> : vector<8xf32>
    %84 = vector.multi_reduction <add>, %83, %cst_53 [1] : vector<8x128xf32> to vector<8xf32>
    %85 = vector.shape_cast %84 : vector<8xf32> to vector<8x1xf32>
    %cst_54 = arith.constant 1.280000e+02 : f32
    %86 = vector.broadcast %cst_54 : f32 to vector<8x1xf32>
    %87 = arith.divf %85, %86 : vector<8x1xf32>
    %88 = vector.broadcast %80 : vector<8x1xf32> to vector<8x128xf32>
    %89 = arith.subf %76, %88 : vector<8x128xf32>
    %cst_55 = arith.constant 9.99999974E-6 : f32
    %90 = vector.broadcast %cst_55 : f32 to vector<8x1xf32>
    %91 = arith.addf %87, %90 : vector<8x1xf32>
    %92 = math.rsqrt %91 : vector<8x1xf32>
    %93 = vector.broadcast %92 : vector<8x1xf32> to vector<8x128xf32>
    %94 = arith.mulf %89, %93 : vector<8x128xf32>
    %95 = vector.broadcast %53 : vector<1x128xf32> to vector<8x128xf32>
    %96 = arith.mulf %94, %95 : vector<8x128xf32>
    %97 = vector.broadcast %54 : vector<1x128xf32> to vector<8x128xf32>
    %98 = arith.addf %96, %97 : vector<8x128xf32>
    %c0_i32_56 = arith.constant 0 : i32
    %c0_i32_57 = arith.constant 0 : i32
    %99 = tpu.memref_slice %arg2[%0, %c0_i32_57] : memref<32x64xf32, #tpu.memory_space<any>> -> memref<1x64xf32, #tpu.memory_space<any>>
    %c0_i32_58 = arith.constant 0 : i32
    %c0_i32_59 = arith.constant 0 : i32
    %100 = tpu.memref_slice %arg18[%c0_i32_58, %c0_i32_59] : memref<8x64xf32, #tpu.memory_space<vmem>> -> memref<1x64xf32, #tpu.memory_space<vmem>>
    %101 = tpu.memref_slice %arg19[%c0_i32_56] : memref<8x!tpu.dma_semaphore, #tpu.memory_space<semaphore_mem>> -> memref<1x!tpu.dma_semaphore, #tpu.memory_space<semaphore_mem>>
    %102 = tpu.memref_squeeze %101 : memref<1x!tpu.dma_semaphore, #tpu.memory_space<semaphore_mem>> -> memref<!tpu.dma_semaphore, #tpu.memory_space<semaphore_mem>>
    tpu.wait_dma2 semaphore(%102 : memref<!tpu.dma_semaphore, #tpu.memory_space<semaphore_mem>>) src(%99 : memref<1x64xf32, #tpu.memory_space<any>>) dst(%100 : memref<1x64xf32, #tpu.memory_space<vmem>>)
    %c1_i32_60 = arith.constant 1 : i32
    %c0_i32_61 = arith.constant 0 : i32
    %103 = tpu.memref_slice %arg2[%5, %c0_i32_61] : memref<32x64xf32, #tpu.memory_space<any>> -> memref<1x64xf32, #tpu.memory_space<any>>
    %c1_i32_62 = arith.constant 1 : i32
    %c0_i32_63 = arith.constant 0 : i32
    %104 = tpu.memref_slice %arg18[%c1_i32_62, %c0_i32_63] : memref<8x64xf32, #tpu.memory_space<vmem>> -> memref<1x64xf32, #tpu.memory_space<vmem>>
    %105 = tpu.memref_slice %arg19[%c1_i32_60] : memref<8x!tpu.dma_semaphore, #tpu.memory_space<semaphore_mem>> -> memref<1x!tpu.dma_semaphore, #tpu.memory_space<semaphore_mem>>
    %106 = tpu.memref_squeeze %105 : memref<1x!tpu.dma_semaphore, #tpu.memory_space<semaphore_mem>> -> memref<!tpu.dma_semaphore, #tpu.memory_space<semaphore_mem>>
    tpu.wait_dma2 semaphore(%106 : memref<!tpu.dma_semaphore, #tpu.memory_space<semaphore_mem>>) src(%103 : memref<1x64xf32, #tpu.memory_space<any>>) dst(%104 : memref<1x64xf32, #tpu.memory_space<vmem>>)
    %c2_i32_64 = arith.constant 2 : i32
    %c0_i32_65 = arith.constant 0 : i32
    %107 = tpu.memref_slice %arg2[%10, %c0_i32_65] : memref<32x64xf32, #tpu.memory_space<any>> -> memref<1x64xf32, #tpu.memory_space<any>>
    %c2_i32_66 = arith.constant 2 : i32
    %c0_i32_67 = arith.constant 0 : i32
    %108 = tpu.memref_slice %arg18[%c2_i32_66, %c0_i32_67] : memref<8x64xf32, #tpu.memory_space<vmem>> -> memref<1x64xf32, #tpu.memory_space<vmem>>
    %109 = tpu.memref_slice %arg19[%c2_i32_64] : memref<8x!tpu.dma_semaphore, #tpu.memory_space<semaphore_mem>> -> memref<1x!tpu.dma_semaphore, #tpu.memory_space<semaphore_mem>>
    %110 = tpu.memref_squeeze %109 : memref<1x!tpu.dma_semaphore, #tpu.memory_space<semaphore_mem>> -> memref<!tpu.dma_semaphore, #tpu.memory_space<semaphore_mem>>
    tpu.wait_dma2 semaphore(%110 : memref<!tpu.dma_semaphore, #tpu.memory_space<semaphore_mem>>) src(%107 : memref<1x64xf32, #tpu.memory_space<any>>) dst(%108 : memref<1x64xf32, #tpu.memory_space<vmem>>)
    %c3_i32_68 = arith.constant 3 : i32
    %c0_i32_69 = arith.constant 0 : i32
    %111 = tpu.memref_slice %arg2[%15, %c0_i32_69] : memref<32x64xf32, #tpu.memory_space<any>> -> memref<1x64xf32, #tpu.memory_space<any>>
    %c3_i32_70 = arith.constant 3 : i32
    %c0_i32_71 = arith.constant 0 : i32
    %112 = tpu.memref_slice %arg18[%c3_i32_70, %c0_i32_71] : memref<8x64xf32, #tpu.memory_space<vmem>> -> memref<1x64xf32, #tpu.memory_space<vmem>>
    %113 = tpu.memref_slice %arg19[%c3_i32_68] : memref<8x!tpu.dma_semaphore, #tpu.memory_space<semaphore_mem>> -> memref<1x!tpu.dma_semaphore, #tpu.memory_space<semaphore_mem>>
    %114 = tpu.memref_squeeze %113 : memref<1x!tpu.dma_semaphore, #tpu.memory_space<semaphore_mem>> -> memref<!tpu.dma_semaphore, #tpu.memory_space<semaphore_mem>>
    tpu.wait_dma2 semaphore(%114 : memref<!tpu.dma_semaphore, #tpu.memory_space<semaphore_mem>>) src(%111 : memref<1x64xf32, #tpu.memory_space<any>>) dst(%112 : memref<1x64xf32, #tpu.memory_space<vmem>>)
    %c4_i32_72 = arith.constant 4 : i32
    %c0_i32_73 = arith.constant 0 : i32
    %115 = tpu.memref_slice %arg2[%20, %c0_i32_73] : memref<32x64xf32, #tpu.memory_space<any>> -> memref<1x64xf32, #tpu.memory_space<any>>
    %c4_i32_74 = arith.constant 4 : i32
    %c0_i32_75 = arith.constant 0 : i32
    %116 = tpu.memref_slice %arg18[%c4_i32_74, %c0_i32_75] : memref<8x64xf32, #tpu.memory_space<vmem>> -> memref<1x64xf32, #tpu.memory_space<vmem>>
    %117 = tpu.memref_slice %arg19[%c4_i32_72] : memref<8x!tpu.dma_semaphore, #tpu.memory_space<semaphore_mem>> -> memref<1x!tpu.dma_semaphore, #tpu.memory_space<semaphore_mem>>
    %118 = tpu.memref_squeeze %117 : memref<1x!tpu.dma_semaphore, #tpu.memory_space<semaphore_mem>> -> memref<!tpu.dma_semaphore, #tpu.memory_space<semaphore_mem>>
    tpu.wait_dma2 semaphore(%118 : memref<!tpu.dma_semaphore, #tpu.memory_space<semaphore_mem>>) src(%115 : memref<1x64xf32, #tpu.memory_space<any>>) dst(%116 : memref<1x64xf32, #tpu.memory_space<vmem>>)
    %c5_i32_76 = arith.constant 5 : i32
    %c0_i32_77 = arith.constant 0 : i32
    %119 = tpu.memref_slice %arg2[%25, %c0_i32_77] : memref<32x64xf32, #tpu.memory_space<any>> -> memref<1x64xf32, #tpu.memory_space<any>>
    %c5_i32_78 = arith.constant 5 : i32
    %c0_i32_79 = arith.constant 0 : i32
    %120 = tpu.memref_slice %arg18[%c5_i32_78, %c0_i32_79] : memref<8x64xf32, #tpu.memory_space<vmem>> -> memref<1x64xf32, #tpu.memory_space<vmem>>
    %121 = tpu.memref_slice %arg19[%c5_i32_76] : memref<8x!tpu.dma_semaphore, #tpu.memory_space<semaphore_mem>> -> memref<1x!tpu.dma_semaphore, #tpu.memory_space<semaphore_mem>>
    %122 = tpu.memref_squeeze %121 : memref<1x!tpu.dma_semaphore, #tpu.memory_space<semaphore_mem>> -> memref<!tpu.dma_semaphore, #tpu.memory_space<semaphore_mem>>
    tpu.wait_dma2 semaphore(%122 : memref<!tpu.dma_semaphore, #tpu.memory_space<semaphore_mem>>) src(%119 : memref<1x64xf32, #tpu.memory_space<any>>) dst(%120 : memref<1x64xf32, #tpu.memory_space<vmem>>)
    %c6_i32_80 = arith.constant 6 : i32
    %c0_i32_81 = arith.constant 0 : i32
    %123 = tpu.memref_slice %arg2[%30, %c0_i32_81] : memref<32x64xf32, #tpu.memory_space<any>> -> memref<1x64xf32, #tpu.memory_space<any>>
    %c6_i32_82 = arith.constant 6 : i32
    %c0_i32_83 = arith.constant 0 : i32
    %124 = tpu.memref_slice %arg18[%c6_i32_82, %c0_i32_83] : memref<8x64xf32, #tpu.memory_space<vmem>> -> memref<1x64xf32, #tpu.memory_space<vmem>>
    %125 = tpu.memref_slice %arg19[%c6_i32_80] : memref<8x!tpu.dma_semaphore, #tpu.memory_space<semaphore_mem>> -> memref<1x!tpu.dma_semaphore, #tpu.memory_space<semaphore_mem>>
    %126 = tpu.memref_squeeze %125 : memref<1x!tpu.dma_semaphore, #tpu.memory_space<semaphore_mem>> -> memref<!tpu.dma_semaphore, #tpu.memory_space<semaphore_mem>>
    tpu.wait_dma2 semaphore(%126 : memref<!tpu.dma_semaphore, #tpu.memory_space<semaphore_mem>>) src(%123 : memref<1x64xf32, #tpu.memory_space<any>>) dst(%124 : memref<1x64xf32, #tpu.memory_space<vmem>>)
    %c7_i32_84 = arith.constant 7 : i32
    %c0_i32_85 = arith.constant 0 : i32
    %127 = tpu.memref_slice %arg2[%35, %c0_i32_85] : memref<32x64xf32, #tpu.memory_space<any>> -> memref<1x64xf32, #tpu.memory_space<any>>
    %c7_i32_86 = arith.constant 7 : i32
    %c0_i32_87 = arith.constant 0 : i32
    %128 = tpu.memref_slice %arg18[%c7_i32_86, %c0_i32_87] : memref<8x64xf32, #tpu.memory_space<vmem>> -> memref<1x64xf32, #tpu.memory_space<vmem>>
    %129 = tpu.memref_slice %arg19[%c7_i32_84] : memref<8x!tpu.dma_semaphore, #tpu.memory_space<semaphore_mem>> -> memref<1x!tpu.dma_semaphore, #tpu.memory_space<semaphore_mem>>
    %130 = tpu.memref_squeeze %129 : memref<1x!tpu.dma_semaphore, #tpu.memory_space<semaphore_mem>> -> memref<!tpu.dma_semaphore, #tpu.memory_space<semaphore_mem>>
    tpu.wait_dma2 semaphore(%130 : memref<!tpu.dma_semaphore, #tpu.memory_space<semaphore_mem>>) src(%127 : memref<1x64xf32, #tpu.memory_space<any>>) dst(%128 : memref<1x64xf32, #tpu.memory_space<vmem>>)
    %c0_88 = arith.constant 0 : index
    %c0_89 = arith.constant 0 : index
    %131 = vector.load %arg18[%c0_88, %c0_89] : memref<8x64xf32, #tpu.memory_space<vmem>>, vector<8x64xf32>
    %c0_90 = arith.constant 0 : index
    %c0_91 = arith.constant 0 : index
    %132 = vector.load %arg11[%c0_90, %c0_91] : memref<64x128xbf16, #tpu.memory_space<vmem>>, vector<64x128xbf16>
    %c0_92 = arith.constant 0 : index
    %c0_93 = arith.constant 0 : index
    %133 = vector.load %arg12[%c0_92, %c0_93] : memref<1x128xf32, #tpu.memory_space<vmem>>, vector<1x128xf32>
    %c0_94 = arith.constant 0 : index
    %c0_95 = arith.constant 0 : index
    %134 = vector.load %arg13[%c0_94, %c0_95] : memref<128x128xbf16, #tpu.memory_space<vmem>>, vector<128x128xbf16>
    %c0_96 = arith.constant 0 : index
    %c0_97 = arith.constant 0 : index
    %135 = vector.load %arg14[%c0_96, %c0_97] : memref<1x128xf32, #tpu.memory_space<vmem>>, vector<1x128xf32>
    %c0_98 = arith.constant 0 : index
    %c0_99 = arith.constant 0 : index
    %136 = vector.load %arg15[%c0_98, %c0_99] : memref<1x128xf32, #tpu.memory_space<vmem>>, vector<1x128xf32>
    %c0_100 = arith.constant 0 : index
    %c0_101 = arith.constant 0 : index
    %137 = vector.load %arg16[%c0_100, %c0_101] : memref<1x128xf32, #tpu.memory_space<vmem>>, vector<1x128xf32>
    %138 = arith.truncf %131 : vector<8x64xf32> to vector<8x64xbf16>
    %cst_102 = arith.constant dense<0.000000e+00> : vector<8x128xf32>
    %139 = tpu.matmul %138, %132, %cst_102 {dimension_numbers = #tpu.dot_dimension_numbers<[1], [0], [0], [1], [0, 0, 1, 1], [], []>} : vector<8x64xbf16>, vector<64x128xbf16>, vector<8x128xf32> -> vector<8x128xf32>
    %140 = vector.broadcast %133 : vector<1x128xf32> to vector<8x128xf32>
    %141 = arith.addf %139, %140 : vector<8x128xf32>
    %142 = arith.mulf %141, %141 : vector<8x128xf32>
    %143 = arith.mulf %141, %142 : vector<8x128xf32>
    %cst_103 = arith.constant 4.471500e-02 : f32
    %144 = vector.broadcast %cst_103 : f32 to vector<8x128xf32>
    %145 = arith.mulf %144, %143 : vector<8x128xf32>
    %146 = arith.addf %141, %145 : vector<8x128xf32>
    %cst_104 = arith.constant 0.797884583 : f32
    %147 = vector.broadcast %cst_104 : f32 to vector<8x128xf32>
    %148 = arith.mulf %147, %146 : vector<8x128xf32>
    %149 = math.tanh %148 : vector<8x128xf32>
    %cst_105 = arith.constant 1.000000e+00 : f32
    %150 = vector.broadcast %cst_105 : f32 to vector<8x128xf32>
    %151 = arith.addf %150, %149 : vector<8x128xf32>
    %cst_106 = arith.constant 5.000000e-01 : f32
    %152 = vector.broadcast %cst_106 : f32 to vector<8x128xf32>
    %153 = arith.mulf %152, %151 : vector<8x128xf32>
    %154 = arith.mulf %141, %153 : vector<8x128xf32>
    %155 = arith.truncf %154 : vector<8x128xf32> to vector<8x128xbf16>
    %cst_107 = arith.constant dense<0.000000e+00> : vector<8x128xf32>
    %156 = tpu.matmul %155, %134, %cst_107 {dimension_numbers = #tpu.dot_dimension_numbers<[1], [0], [0], [1], [0, 0, 1, 1], [], []>} : vector<8x128xbf16>, vector<128x128xbf16>, vector<8x128xf32> -> vector<8x128xf32>
    %157 = vector.broadcast %135 : vector<1x128xf32> to vector<8x128xf32>
    %158 = arith.addf %156, %157 : vector<8x128xf32>
    %159 = arith.addf %158, %141 : vector<8x128xf32>
    %cst_108 = arith.constant dense<0.000000e+00> : vector<8xf32>
    %160 = vector.multi_reduction <add>, %159, %cst_108 [1] : vector<8x128xf32> to vector<8xf32>
    %161 = vector.shape_cast %160 : vector<8xf32> to vector<8x1xf32>
    %cst_109 = arith.constant 1.280000e+02 : f32
    %162 = vector.broadcast %cst_109 : f32 to vector<8x1xf32>
    %163 = arith.divf %161, %162 : vector<8x1xf32>
    %164 = vector.broadcast %163 : vector<8x1xf32> to vector<8x128xf32>
    %165 = arith.subf %159, %164 : vector<8x128xf32>
    %166 = arith.mulf %165, %165 : vector<8x128xf32>
    %cst_110 = arith.constant dense<0.000000e+00> : vector<8xf32>
    %167 = vector.multi_reduction <add>, %166, %cst_110 [1] : vector<8x128xf32> to vector<8xf32>
    %168 = vector.shape_cast %167 : vector<8xf32> to vector<8x1xf32>
    %cst_111 = arith.constant 1.280000e+02 : f32
    %169 = vector.broadcast %cst_111 : f32 to vector<8x1xf32>
    %170 = arith.divf %168, %169 : vector<8x1xf32>
    %171 = vector.broadcast %163 : vector<8x1xf32> to vector<8x128xf32>
    %172 = arith.subf %159, %171 : vector<8x128xf32>
    %cst_112 = arith.constant 9.99999974E-6 : f32
    %173 = vector.broadcast %cst_112 : f32 to vector<8x1xf32>
    %174 = arith.addf %170, %173 : vector<8x1xf32>
    %175 = math.rsqrt %174 : vector<8x1xf32>
    %176 = vector.broadcast %175 : vector<8x1xf32> to vector<8x128xf32>
    %177 = arith.mulf %172, %176 : vector<8x128xf32>
    %178 = vector.broadcast %136 : vector<1x128xf32> to vector<8x128xf32>
    %179 = arith.mulf %177, %178 : vector<8x128xf32>
    %180 = vector.broadcast %137 : vector<1x128xf32> to vector<8x128xf32>
    %181 = arith.addf %179, %180 : vector<8x128xf32>
    %182 = arith.truncf %98 : vector<8x128xf32> to vector<8x128xbf16>
    %183 = arith.truncf %181 : vector<8x128xf32> to vector<8x128xbf16>
    %cst_113 = arith.constant dense<0.000000e+00> : vector<8x8xf32>
    %184 = tpu.matmul %182, %183, %cst_113 {dimension_numbers = #tpu.dot_dimension_numbers<[1], [1], [0], [0], [0, 0, 1, 0], [], []>} : vector<8x128xbf16>, vector<8x128xbf16>, vector<8x8xf32> -> vector<8x8xf32>
    %cst_114 = arith.constant 1.000000e+00 : f32
    %185 = vector.broadcast %cst_114 : f32 to vector<8x8xf32>
    %186 = arith.mulf %184, %185 : vector<8x8xf32>
    %cst_115 = arith.constant dense<0xFF800000> : vector<8xf32>
    %187 = vector.multi_reduction <maximumf>, %186, %cst_115 [1] : vector<8x8xf32> to vector<8xf32>
    %188 = vector.shape_cast %187 : vector<8xf32> to vector<8x1xf32>
    %189 = vector.broadcast %188 : vector<8x1xf32> to vector<8x8xf32>
    %190 = arith.subf %186, %189 : vector<8x8xf32>
    %191 = math.exp %190 : vector<8x8xf32>
    %cst_116 = arith.constant dense<0.000000e+00> : vector<8xf32>
    %192 = vector.multi_reduction <add>, %191, %cst_116 [1] : vector<8x8xf32> to vector<8xf32>
    %193 = vector.shape_cast %192 : vector<8xf32> to vector<8x1xf32>
    %194 = math.log %193 : vector<8x1xf32>
    %195 = arith.addf %194, %188 : vector<8x1xf32>
    %cst_117 = arith.constant dense<0xFF800000> : vector<8xf32>
    %196 = vector.multi_reduction <maximumf>, %186, %cst_117 [0] : vector<8x8xf32> to vector<8xf32>
    %197 = vector.shape_cast %196 : vector<8xf32> to vector<1x8xf32>
    %198 = vector.broadcast %197 : vector<1x8xf32> to vector<8x8xf32>
    %199 = arith.subf %186, %198 : vector<8x8xf32>
    %200 = math.exp %199 : vector<8x8xf32>
    %cst_118 = arith.constant dense<0.000000e+00> : vector<8xf32>
    %201 = vector.multi_reduction <add>, %200, %cst_118 [0] : vector<8x8xf32> to vector<8xf32>
    %202 = vector.shape_cast %201 : vector<8xf32> to vector<1x8xf32>
    %203 = math.log %202 : vector<1x8xf32>
    %204 = arith.addf %203, %197 : vector<1x8xf32>
    %205 = arith.extf %182 : vector<8x128xbf16> to vector<8x128xf32>
    %206 = arith.extf %183 : vector<8x128xbf16> to vector<8x128xf32>
    %207 = arith.mulf %205, %206 : vector<8x128xf32>
    %cst_119 = arith.constant dense<0.000000e+00> : vector<8xf32>
    %208 = vector.multi_reduction <add>, %207, %cst_119 [1] : vector<8x128xf32> to vector<8xf32>
    %209 = vector.shape_cast %208 : vector<8xf32> to vector<8x1xf32>
    %cst_120 = arith.constant dense<0.000000e+00> : vector<1xf32>
    %210 = vector.multi_reduction <add>, %209, %cst_120 [0] : vector<8x1xf32> to vector<1xf32>
    %211 = vector.shape_cast %210 : vector<1xf32> to vector<1x1xf32>
    %cst_121 = arith.constant 1.000000e+00 : f32
    %212 = vector.broadcast %cst_121 : f32 to vector<1x1xf32>
    %213 = arith.mulf %211, %212 : vector<1x1xf32>
    %cst_122 = arith.constant dense<0.000000e+00> : vector<1xf32>
    %214 = vector.multi_reduction <add>, %195, %cst_122 [0] : vector<8x1xf32> to vector<1xf32>
    %215 = vector.shape_cast %214 : vector<1xf32> to vector<1x1xf32>
    %cst_123 = arith.constant dense<0.000000e+00> : vector<1xf32>
    %216 = vector.multi_reduction <add>, %204, %cst_123 [1] : vector<1x8xf32> to vector<1xf32>
    %217 = vector.shape_cast %216 : vector<1xf32> to vector<1x1xf32>
    %218 = arith.addf %215, %217 : vector<1x1xf32>
    %cst_124 = arith.constant 2.000000e+00 : f32
    %219 = vector.broadcast %cst_124 : f32 to vector<1x1xf32>
    %220 = arith.mulf %219, %213 : vector<1x1xf32>
    %221 = arith.subf %218, %220 : vector<1x1xf32>
    %cst_125 = arith.constant 6.250000e-02 : f32
    %222 = vector.broadcast %cst_125 : f32 to vector<1x1xf32>
    %223 = arith.mulf %221, %222 : vector<1x1xf32>
    %c0_126 = arith.constant 0 : index
    %c0_127 = arith.constant 0 : index
    %224 = vector.load %arg17[%c0_126, %c0_127] : memref<1x1xf32, #tpu.memory_space<vmem>>, vector<1x1xf32>
    tpu.vector_store %arg17[%c0_126, %c0_127], %223 {strides = array<i32>} : memref<1x1xf32, #tpu.memory_space<vmem>>, vector<1x1xf32>,
    return
  }
}

</mosaic_0001>

<bundles_post_ra>
// kernel: tpu_custom_call.1
= control target key start
LH: loop header
LB: loop body
LE: loop exit
PB: predicated region body
PF: predicated region fallthrough
CT: control target
= control target key end

     0   :  { %s1931_s0 = inlined_call_operand.hbm [shape: s32[8], index: 0, kind: input, shape index: {}]   ;;  %s1932_s1 = inlined_call_operand.hbm [shape: f32[8,4,256], index: 1, kind: input, shape index: {}]   ;;  %s1933_s2 = inlined_call_operand.hbm [shape: f32[32,64], index: 2, kind: input, shape index: {}]   ;;  %s1934_s3 = inlined_call_operand.hbm [shape: f32[4,128], index: 3, kind: input, shape index: {}]   ;;  %s1935_s4 = inlined_call_operand.vmem [shape: f32[1,128], index: 4, kind: input, shape index: {}]   ;;  %s1936_s5 = inlined_call_operand.hbm [shape: bf16[128,128], index: 5, kind: input, shape index: {}]   ;;  %s1937_s6 = inlined_call_operand.vmem [shape: f32[1,128], index: 6, kind: input, shape index: {}]   ;;  %s1938_s7 = inlined_call_operand.hbm [shape: bf16[128,128], index: 7, kind: input, shape index: {}]   ;;  %s1939_s8 = inlined_call_operand.vmem [shape: f32[1,128], index: 8, kind: input, shape index: {}]   ;;  %s1940_s9 = inlined_call_operand.vmem [shape: f32[1,128], index: 9, kind: input, shape index: {}]   ;;  %s1941_s10 = inlined_call_operand.vmem [shape: f32[1,128], index: 10, kind: input, shape index: {}]   ;;  %s1942_s11 = inlined_call_operand.hbm [shape: bf16[64,128], index: 11, kind: input, shape index: {}]   ;;  %s1943_s12 = inlined_call_operand.vmem [shape: f32[1,128], index: 12, kind: input, shape index: {}]   ;;  %s1944_s13 = inlined_call_operand.hbm [shape: bf16[128,128], index: 13, kind: input, shape index: {}]   ;;  %s1945_s14 = inlined_call_operand.vmem [shape: f32[1,128], index: 14, kind: input, shape index: {}]   ;;  %s1946_s15 = inlined_call_operand.vmem [shape: f32[1,128], index: 15, kind: input, shape index: {}]   ;;  %s1947_s16 = inlined_call_operand.vmem [shape: f32[1,128], index: 16, kind: input, shape index: {}]   ;;  %s1948_s17 = inlined_call_operand.hbm [shape: f32[1,1], index: 17, kind: output, shape index: {}]  }
   0x1   :  { %1949 = sst [smem:[#allocation50_spill]] %s1931_s0 }
   0x2   :  { %1950 = sst [smem:[#allocation51_spill]] %s1932_s1 }
   0x3   :  { %1951 = sst [smem:[#allocation52_spill]] %s1948_s17 }
   0x4   :  { %22 = vsyncpa [#allocation7], 0 }
   0x5   :  { %23 = vsyncpa [#allocation5], 0 }
   0x6   :  { %24 = vsyncpa [#allocation10], 0 }
   0x7   :  { %25 = vsyncpa [#allocation13], 0 }
   0x8   :  { %26 = vsyncpa [#allocation16], 0  ;;  %s55_s26 = sshll.u32 %s1934_s3, 4  ;;  %s56_s26 = int_to_ptr.hbm [resolvable:$true] %s55_s26 }
   0x9   :  { %27 = vsyncpa [#allocation6], 0  ;;  %s1644_s27 = smov [#allocation9]   ;;  %s82_s30 = sshll.u32 %s1938_s7, 4  ;;  %s83_s30 = int_to_ptr.hbm [resolvable:$true] %s82_s30 }
   0xa   :  { %s57_s28 = sshll.u32 %s1644_s27, 4  ;;  %s1645_s18 = smov [#allocation12]   ;;  %s58_s28 = int_to_ptr.vmem [resolvable:$true] %s57_s28 }
   0xb   :  { %60 = dma.hbm_to_vmem [thread:$0]  %s56_s26, 64, %s58_s28, [#allocation10]  }
   0xc   :  { %s84_s19 = sshll.u32 %s1645_s18, 4  ;;  %s1952_s21 = sld [smem:[#allocation50_spill]]  ;;  %s85_s19 = int_to_ptr.vmem [resolvable:$true] %s84_s19 }
   0xd   :  { %s1646_s3 = smov 64   ;;  %s1647_s23 = smov 4  }
   0xe   :  { %90 = dma.hbm_to_vmem [thread:$0]  %s83_s30, 1024, %s85_s19, [#allocation13], %s1646_s3, %s1646_s3, %s1647_s23  }
   0xf   :  { %s1953_s26 = sld [smem:[#allocation51_spill]]  ;;  %s1648_s7 = smov [#allocation4]  }
  0x10   :  { %s1649_s28 = smov [#allocation8]   ;;  %s1650_s0 = smov 128  }
  0x11   :  { %s43_s29 = sshll.u32 %s1649_s28, 4  ;;  %s1651_s18 = smov 8   ;;  %s44_s29 = int_to_ptr.vmem [resolvable:$true] %s43_s29 }
  0x12   :  { %s33_s22 = sshll.u32 %s1952_s21, 4  ;;  %s67_s21 = sshll.u32 %s1936_s5, 4  ;;  %s34_s22 = int_to_ptr.hbm [resolvable:$true] %s33_s22  ;;  %s68_s21 = int_to_ptr.hbm [resolvable:$true] %s67_s21 }
  0x13   :  { %36 = dma.hbm_to_smem %s34_s22, 16, %s1648_s7, [#allocation7]  }
  0x14   :  { %s1652_s17 = smov [#allocation11]   ;;  %s101_s25 = sshll.u32 %s1942_s11, 4  ;;  %s102_s25 = int_to_ptr.hbm [resolvable:$true] %s101_s25 }
  0x15   :  { %s41_s27 = sshll.u32 %s1953_s26, 4  ;;  %s69_s30 = sshll.u32 %s1652_s17, 4  ;;  %s42_s27 = int_to_ptr.hbm [resolvable:$true] %s41_s27  ;;  %s70_s30 = int_to_ptr.vmem [resolvable:$true] %s69_s30 }
  0x16   :  { %49 = dma.hbm_to_vmem [thread:$0]  %s42_s27, 1024, %s44_s29, [#allocation5], %s1650_s0, %s1650_s0, %s1651_s18  }
  0x17   :  { %75 = dma.hbm_to_vmem [thread:$0]  %s68_s21, 1024, %s70_s30, [#allocation10], %s1646_s3, %s1646_s3, %s1647_s23  }
  0x18   :  { %s1653_s22 = smov [#allocation14]   ;;  %s116_s28 = sshll.u32 %s1944_s13, 4  ;;  %s117_s28 = int_to_ptr.hbm [resolvable:$true] %s116_s28 }
  0x19   :  { %s103_s26 = sshll.u32 %s1653_s22, 4  ;;  %s1654_s5 = smov [#allocation15]   ;;  %s104_s26 = int_to_ptr.vmem [resolvable:$true] %s103_s26 }
  0x1a   :  { %109 = dma.hbm_to_vmem [thread:$0]  %s102_s25, 512, %s104_s26, [#allocation13], %s1646_s3, %s1646_s3, %s1647_s23  }
  0x1b   :  { %s118_s17 = sshll.u32 %s1654_s5, 4  ;;  %s119_s17 = int_to_ptr.vmem [resolvable:$true] %s118_s17 }
  0x1c   :  { %124 = dma.hbm_to_vmem [thread:$0]  %s117_s28, 1024, %s119_s17, [#allocation16], %s1646_s3, %s1646_s3, %s1647_s23  }
  0x1d   :  { %1616 = dma.done.wait [#allocation7], 16  }
  0x1e   :  { %1617 = vsyncadd [#allocation7], 4294967280 }
  0x1f   :  { %1618 = dma.done.wait [#allocation5], 1024  }
  0x20   :  { %1619 = vsyncadd [#allocation5], 4294966272 }
  0x21   :  { %1620 = dma.done.wait [#allocation10], 1088  }
  0x22   :  { %1621 = vsyncadd [#allocation10], 4294966208 }
  0x23   :  { %1622 = dma.done.wait [#allocation13], 1536  }
  0x24   :  { %1623 = vsyncadd [#allocation13], 4294965760 }
  0x25   :  { %1624 = dma.done.wait [#allocation16], 1024  }
  0x26   :  { %1625 = vsyncadd [#allocation16], 4294966272 }
  0x27   :  { %159 = sfence }
  0x28   :  { %v295_v0 = vld [vmem:[#allocation8] sm:$0xff]  ;;  %v297_v1 = vld [vmem:[#allocation8 + $0x10] sm:$0xff]  ;;  %v296_v2 = vld [vmem:[#allocation8 + $0x8] sm:$0xff]  ;;  %vm354_vm0 = vcmask 1043456   ;;  %v1655_v48 = vmov 256.0   ;;  %v423_v61 = vlaneseq  ;;  %vm433_vm2 = vcmask 1041409  }
  0x29   :  { %311 = vst [vmem:[#allocation1] ss:$2 sm:$0xff] %v295_v0  ;;  %v298_v3 = vld [vmem:[#allocation8 + $0x18] sm:$0xff]  ;;  %v299_v4 = vld [vmem:[#allocation8 + $0x20] sm:$0xff]  ;;  %v301_v5 = vld [vmem:[#allocation8 + $0x30] sm:$0xff]  ;;  %1220 = vrcp.f32 %v1655_v48  ;;  %vm435_vm3 = vcmask 1042434  }
  0x2a   :  { %319 = vst [vmem:[#allocation1 + $0x20] ss:$2 sm:$0xff] %v297_v1  ;;  %v300_v10 = vld [vmem:[#allocation8 + $0x28] sm:$0xff]  ;;  %v302_v16 = vld [vmem:[#allocation8 + $0x38] sm:$0xff]  ;;  %v410_v51 = vld [vmem:[#allocation9] sm:$0xf] }
  0x2b   :  { %315 = vst [vmem:[#allocation1 + $0x10] ss:$2 sm:$0xff] %v296_v2  ;;  %1042 = vmatpush.msk.msra.mxu0 %vm354_vm0, %v410_v51  ;;  %v1172_v53 = vld [vmem:[#allocation11 + $0x38] sm:$0xff]  ;;  %v1171_v54 = vld [vmem:[#allocation11 + $0x30] sm:$0xff]  ;;  %v1170_v56 = vld [vmem:[#allocation11 + $0x28] sm:$0xff]  ;;  %v424_v0 = vand.u32 127, %v423_v61 }
  0x2c   :  { %323 = vst [vmem:[#allocation1 + $0x30] ss:$2 sm:$0xff] %v298_v3  ;;  %561 = vmatpush.bf16.msra.mxu1 %v1172_v53  ;;  %v1169_v60 = vld [vmem:[#allocation11 + $0x20] sm:$0xff]  ;;  %v1168_v63 = vld [vmem:[#allocation11 + $0x18] sm:$0xff]  ;;  %vm437_vm4 = vcmask 1043459   ;;  %vm439_vm5 = vcmask 1044484  }
  0x2d   :  { %vm441_vm6 = vcmask 1045509   ;;  %vm443_vm7 = vcmask 1046534   ;;  %vm445_vm8 = vcmask 1047559   ;;  %vm447_vm9 = vcmask 31744   ;;  %s1822_s0 = sld [smem:[#allocation4 + $0x2]]  ;;  %s1657_s25 = smov [#allocation2]  }
  0x2e   :  { %s1824_s18 = sld [smem:[#allocation4 + $0x3]]  ;;  %s172_s22 = sshll.u32 %s1657_s25, 4  ;;  %s173_s22 = int_to_ptr.vmem [resolvable:$true] %s172_s22 }
  0x2f   :  { %v1221_v49 = vpop.eup %1220  ;;  %s1826_s1 = sld [smem:[#allocation4 + $0x4]]  ;;  %s1836_s5 = scalar_lea.hbm %s1933_s2, 32 }
  0x30   :  { %v312_v6 = vld.sshfl [vmem:[#allocation1] sm:$0xff pattern:$0x75316420]  ;;  %v313_v7 = vld.sshfl [vmem:[#allocation1 + $0x8] sm:$0xff pattern:$0x75316420]  ;;  %562 = vmatpush.bf16.msra.mxu1 %v1171_v54  ;;  %vm400_vm1 = vweird.f32 %v1221_v49 }
  0x31   :  { %v355_v8 = vsel %vm354_vm0, %v312_v6, 0.0  ;;  %v356_v9 = vsel %vm354_vm0, %v313_v7, 0.0  ;;  %326 = vst [vmem:[#allocation1] ss:$2 sm:$0xff] %v299_v4  ;;  %v396_v50 = vmul.f32 256.0, %v1221_v49  ;;  %v1167_v7 = vld [vmem:[#allocation11 + $0x10] sm:$0xff] }
  0x32   :  { %v357_v11 = vadd.f32 %v356_v9, %v355_v8  ;;  %v320_v12 = vld.sshfl [vmem:[#allocation1 + $0x20] sm:$0xff pattern:$0x75316420]  ;;  %v321_v13 = vld.sshfl [vmem:[#allocation1 + $0x28] sm:$0xff pattern:$0x75316420] }
  0x33   :  { %v365_v14 = vsel %vm354_vm0, %v320_v12, 0.0  ;;  %v366_v15 = vsel %vm354_vm0, %v321_v13, 0.0  ;;  %332 = vst [vmem:[#allocation1 + $0x20] ss:$2 sm:$0xff] %v301_v5  ;;  %v397_v52 = vsub.f32 1.0, %v396_v50  ;;  %s1828_s20 = sld [smem:[#allocation4 + $0x5]] }
  0x34   :  { %358 = vadd.xlane.f32.xlu0 %v357_v11  ;;  %v367_v17 = vadd.f32 %v366_v15, %v365_v14  ;;  %v316_v18 = vld.sshfl [vmem:[#allocation1 + $0x10] sm:$0xff pattern:$0x75316420]  ;;  %v317_v19 = vld.sshfl [vmem:[#allocation1 + $0x18] sm:$0xff pattern:$0x75316420]  ;;  %563 = vmatpush.bf16.msra.mxu1 %v1170_v56 }
  0x35   :  { %329 = vst [vmem:[#allocation1 + $0x10] ss:$2 sm:$0xff] %v300_v10  ;;  %v360_v20 = vsel %vm354_vm0, %v316_v18, 0.0  ;;  %v361_v21 = vsel %vm354_vm0, %v317_v19, 0.0  ;;  %v398_v55 = vmul.f32 %v1221_v49, %v397_v52 }
  0x36   :  { %368 = vadd.xlane.f32.xlu1 %v367_v17  ;;  %v324_v22 = vld.sshfl [vmem:[#allocation1 + $0x30] sm:$0xff pattern:$0x75316420]  ;;  %v325_v23 = vld.sshfl [vmem:[#allocation1 + $0x38] sm:$0xff pattern:$0x75316420]  ;;  %v362_v26 = vadd.f32 %v361_v21, %v360_v20 }
  0x37   :  { %335 = vst [vmem:[#allocation1 + $0x30] ss:$2 sm:$0xff] %v302_v16  ;;  %v370_v24 = vsel %vm354_vm0, %v324_v22, 0.0  ;;  %v371_v25 = vsel %vm354_vm0, %v325_v23, 0.0  ;;  %v399_v57 = vadd.f32 %v1221_v49, %v398_v55  ;;  %v1166_v16 = vld [vmem:[#allocation11 + $0x8] sm:$0xff] }
  0x38   :  { %v327_v27 = vld.sshfl [vmem:[#allocation1] sm:$0xff pattern:$0x75316420]  ;;  %v328_v28 = vld.sshfl [vmem:[#allocation1 + $0x8] sm:$0xff pattern:$0x75316420]  ;;  %v372_v32 = vadd.f32 %v371_v25, %v370_v24  ;;  %564 = vmatpush.bf16.msra.mxu1 %v1169_v60 }
  0x39   :  { %v375_v29 = vsel %vm354_vm0, %v327_v27, 0.0  ;;  %v376_v30 = vsel %vm354_vm0, %v328_v28, 0.0  ;;  %v401_v62 = vsel %vm400_vm1, %v1221_v49, %v399_v57 }
  0x3a   :  { %v377_v31 = vadd.f32 %v376_v30, %v375_v29  ;;  %v333_v33 = vld.sshfl [vmem:[#allocation1 + $0x20] sm:$0xff pattern:$0x75316420]  ;;  %v334_v34 = vld.sshfl [vmem:[#allocation1 + $0x28] sm:$0xff pattern:$0x75316420] }
  0x3b   :  { %v385_v39 = vsel %vm354_vm0, %v333_v33, 0.0  ;;  %v386_v40 = vsel %vm354_vm0, %v334_v34, 0.0  ;;  %v1180_v33 = vld [vmem:[#allocation12 + $0x38] sm:$0xff]  ;;  %v1215_v34 = vld [vmem:[%s1935_s4] ss:$0 sm:$0xff] }
  0x3c   :  { %363 = vadd.xlane.f32.xlu0 %v362_v26  ;;  %378 = vadd.xlane.f32.xlu2 %v377_v31  ;;  %v330_v35 = vld.sshfl [vmem:[#allocation1 + $0x10] sm:$0xff pattern:$0x75316420]  ;;  %v331_v36 = vld.sshfl [vmem:[#allocation1 + $0x18] sm:$0xff pattern:$0x75316420]  ;;  %v387_v46 = vadd.f32 %v386_v40, %v385_v39 }
  0x3d   :  { %v380_v37 = vsel %vm354_vm0, %v330_v35, 0.0  ;;  %v381_v38 = vsel %vm354_vm0, %v331_v36, 0.0  ;;  %565 = vmatpush.bf16.msra.mxu1 %v1168_v63  ;;  %635 = vmatpush.bf16.msra.mxu2 %v1180_v33  ;;  %v1178_v39 = vld [vmem:[#allocation12 + $0x28] sm:$0xff]  ;;  %v1177_v40 = vld [vmem:[#allocation12 + $0x20] sm:$0xff] }
  0x3e   :  { %373 = vadd.xlane.f32.xlu1 %v372_v32  ;;  %v336_v41 = vld.sshfl [vmem:[#allocation1 + $0x30] sm:$0xff pattern:$0x75316420]  ;;  %v337_v42 = vld.sshfl [vmem:[#allocation1 + $0x38] sm:$0xff pattern:$0x75316420]  ;;  %v382_v45 = vadd.f32 %v381_v38, %v380_v37 }
  0x3f   :  { %v390_v43 = vsel %vm354_vm0, %v336_v41, 0.0  ;;  %v391_v44 = vsel %vm354_vm0, %v337_v42, 0.0  ;;  %v1165_v32 = vld [vmem:[#allocation11] sm:$0xff]  ;;  %v1179_v38 = vld [vmem:[#allocation12 + $0x30] sm:$0xff]  ;;  %v1176_v41 = vld [vmem:[#allocation12 + $0x18] sm:$0xff] }
  0x40   :  { %v392_v47 = vadd.f32 %v391_v44, %v390_v43  ;;  %v1175_v42 = vld [vmem:[#allocation12 + $0x10] sm:$0xff]  ;;  %v1174_v43 = vld [vmem:[#allocation12 + $0x8] sm:$0xff]  ;;  %v1173_v44 = vld [vmem:[#allocation12] sm:$0xff] }
  0x41   :  { %566 = vmatpush.bf16.msra.mxu1 %v1167_v7  ;;  %636 = vmatpush.bf16.msra.mxu2 %v1179_v38 }
  0x44   :  { %383 = vadd.xlane.f32.xlu2 %v382_v45  ;;  %388 = vadd.xlane.f32.xlu0 %v387_v46  ;;  %v1216_v45 = vld [vmem:[%s1937_s6] ss:$0 sm:$0xff]  ;;  %s161_s6 = sld [smem:[#allocation4]] }
  0x45   :  { %567 = vmatpush.bf16.msra.mxu1 %v1166_v16  ;;  %637 = vmatpush.bf16.msra.mxu2 %v1178_v39 }
  0x46   :  { %393 = vadd.xlane.f32.xlu1 %v392_v47 }
  0x49   :  { %568 = vmatpush.bf16.msra.mxu1 %v1165_v32  ;;  %638 = vmatpush.bf16.msra.mxu2 %v1177_v40 }
  0x4a   :  { %s162_s19 = scalar_lea.hbm %s1933_s2, %s161_s6 }
  0x4b   :  { %s170_s24 = sshll.u32 %s162_s19, 4  ;;  %s171_s24 = int_to_ptr.hbm [resolvable:$true] %s170_s24 }
  0x4c   :  { %s1400_s26 = sshra.s32 %s171_s24, 4  ;;  %s1401_s26 = int_to_ptr.hbm [resolvable:$true] %s1400_s26 }
  0x4d   :  { %639 = vmatpush.bf16.msra.mxu2 %v1176_v41  ;;  %s1402_s27 = scalar_lea.hbm %s1401_s26, 1  ;;  %p1405_p1 = scmp.lt.s32.totalorder %s1401_s26, %s1933_s2 }
  0x4e   :  { %p1403_p0 = scmp.ne.s32.totalorder %s1401_s26, %s1402_s27  ;;  %p1406_p2 = scmp.lt.s32.totalorder %s1836_s5, %s1402_s27 }
  0x50   :  { %p1407_p3 = por %p1406_p2, %p1405_p1 }
  0x51   :  { %640 = vmatpush.bf16.msra.mxu2 %v1175_v42 }
  0x52   :  { %p1408_p4 = pnand %p1407_p3, %p1403_p0 }
  0x55   :  { %641 = vmatpush.bf16.msra.mxu2 %v1174_v43 }
  0x59   :  { %642 = vmatpush.bf16.msra.mxu2 %v1173_v44 }
  0xa7   :  { %v359_v58 = vpop.xlane.xlu0 %358 }
  0xa8   :  { %v402_v1 = vmul.f32 %v401_v62, %v359_v58 }
  0xa9   :  { %v369_v59 = vpop.xlane.xlu1 %368 }
  0xaa   :  { %v404_v2 = vmul.f32 %v401_v62, %v369_v59  ;;  %v425_v8 = vperm.slane %v402_v1, %v424_v0  ;;  %v1217_v59 = vld [vmem:[%s1939_s8] ss:$0 sm:$0xff]  ;;  %s1035_s8 = sld [smem:[#allocation4 + $0x1]] }
  0xac   :  { %v427_v11 = vperm.slane %v404_v2, %v424_v0 }
  0xaf   :  { %v364_v3 = vpop.xlane.xlu0 %363  ;;  %v379_v4 = vpop.xlane.xlu2 %378 }
  0xb0   :  { %v403_v5 = vmul.f32 %v401_v62, %v364_v3  ;;  %v406_v14 = vmul.f32 %v401_v62, %v379_v4 }
  0xb1   :  { %v374_v6 = vpop.xlane.xlu1 %373 }
  0xb2   :  { %v426_v9 = vperm.slane %v403_v5, %v424_v0  ;;  %v405_v10 = vmul.f32 %v401_v62, %v374_v6  ;;  %v429_v22 = vperm.slane %v406_v14, %v424_v0 }
  0xb4   :  { %v434_v12 = vsel %vm433_vm2, %v426_v9, %v425_v8  ;;  %v428_v13 = vperm.slane %v405_v10, %v424_v0 }
  0xb5   :  { %v436_v15 = vsel %vm435_vm3, %v427_v11, %v434_v12 }
  0xb6   :  { %v438_v19 = vsel %vm437_vm4, %v428_v13, %v436_v15 }
  0xb7   :  { %v384_v17 = vpop.xlane.xlu2 %383  ;;  %v389_v18 = vpop.xlane.xlu0 %388  ;;  %v440_v27 = vsel %vm439_vm5, %v429_v22, %v438_v19 }
  0xb8   :  { %v407_v20 = vmul.f32 %v401_v62, %v384_v17  ;;  %v408_v21 = vmul.f32 %v401_v62, %v389_v18 }
  0xb9   :  { %v394_v23 = vpop.xlane.xlu1 %393 }
  0xba   :  { %v430_v24 = vperm.slane %v407_v20, %v424_v0  ;;  %v431_v25 = vperm.slane %v408_v21, %v424_v0  ;;  %v409_v26 = vmul.f32 %v401_v62, %v394_v23 }
  0xbc   :  { %v432_v28 = vperm.slane %v409_v26, %v424_v0  ;;  %v442_v29 = vsel %vm441_vm6, %v430_v24, %v440_v27  ;;  %v1656_v0 = vmov 128.0  }
  0xbd   :  { %v444_v30 = vsel %vm443_vm7, %v431_v25, %v442_v29 }
  0xbe   :  { %v446_v31 = vsel %vm445_vm8, %v432_v28, %v444_v30 }
  0xbf   :  { %1043 = vmatmul.msk.f32.vlgmr.msra.gmra.mxu0 %vm447_vm9, %v446_v31 }
 0x13c   :  { %v470_v35 = vpop.f32.mrf.mxu0 }
 0x13d   :  { %v471_v36 = vadd.f32 %v1215_v34, %v470_v35 }
 0x13f   :  { %v509_v37 = vpack.c.bf16 %v471_v36, %v471_v36 }
 0x141   :  { %569 = vmatmul.bf16.vlgmr.msra.gmra.mxu1 %v509_v37 }
 0x1be   :  { %v570_v46 = vpop.f32.mrf.mxu1 }
 0x1bf   :  { %v571_v47 = vadd.f32 %v1216_v45, %v570_v46 }
 0x1c1   :  { %v574_v48 = vmul.f32 %v571_v47, %v571_v47 }
 0x1c3   :  { %v575_v49 = vmul.f32 %v574_v48, %v571_v47 }
 0x1c5   :  { %v576_v50 = vmul.f32 0.044715, %v575_v49 }
 0x1c6   :  { %v572_v51 = vpop.f32.mrf.mxu1 }
 0x1c7   :  { %v577_v52 = vadd.f32 %v576_v50, %v571_v47 }
 0x1c9   :  { %v578_v53 = vmul.f32 0.7978846, %v577_v52 }
 0x1cb   :  { %1222 = vtanh.f32 %v578_v53 }
 0x1cc   :  { %1224 = vrcp.f32 %v1656_v0 }
 0x1d1   :  { %v1223_v54 = vpop.eup %1222 }
 0x1d2   :  { %v580_v55 = vadd.f32 1.0, %v1223_v54  ;;  %v1225_v1 = vpop.eup %1224 }
 0x1d3   :  { %v652_v2 = vmul.f32 128.0, %v1225_v1  ;;  %vm656_vm10 = vweird.f32 %v1225_v1 }
 0x1d4   :  { %v581_v56 = vmul.f32 0.5, %v580_v55 }
 0x1d5   :  { %v653_v3 = vsub.f32 1.0, %v652_v2 }
 0x1d6   :  { %v582_v57 = vmul.f32 %v581_v56, %v571_v47 }
 0x1d7   :  { %v654_v4 = vmul.f32 %v1225_v1, %v653_v3 }
 0x1d8   :  { %v583_v58 = vpack.c.bf16 %v582_v57, %v582_v57 }
 0x1d9   :  { %v655_v5 = vadd.f32 %v1225_v1, %v654_v4 }
 0x1da   :  { %643 = vmatmul.bf16.vlgmr.msra.gmra.mxu2 %v583_v58 }
 0x1db   :  { %v1815_v6 = vsel %vm656_vm10, %v1225_v1, %v655_v5 }
 0x25d   :  { %v644_v60 = vpop.f32.mrf.mxu2 }
 0x25e   :  { %v645_v61 = vadd.f32 %v1217_v59, %v644_v60 }
 0x260   :  { %v648_v62 = vadd.f32 %v645_v61, %v571_v47 }
 0x262   :  { %649 = vadd.xlane.f32.xlu2 %v648_v62 }
 0x265   :  { %v646_v63 = vpop.f32.mrf.mxu2 }
 0x2d5   :  { %v650_v7 = vpop.xlane.xlu2 %649 }
 0x2d6   :  { %v658_v8 = vmul.f32 %v1815_v6, %v650_v7 }
 0x2d8   :  { %v1818_v9 = vsub.f32 %v648_v62, %v658_v8 }
 0x2da   :  { %v660_v10 = vmul.f32 %v1818_v9, %v1818_v9 }
 0x2dc   :  { %661 = vadd.xlane.f32.xlu0 %v660_v10 }
 0x2dd   :  { %1411 = shalt.err (!%p1408_p4)  }
 0x2de   :  { %175 = dma.hbm_to_vmem [thread:$0]  %s171_s24, 16, %s173_s22, [#allocation3] }
 0x2df   :  { %s177_s4 = scalar_lea.hbm %s1933_s2, %s1035_s8  ;;  %s1658_s29 = smov [#allocation2 + $0x1]  }
 0x2e0   :  { %s187_s23 = sshll.u32 %s177_s4, 4  ;;  %s189_s6 = sshll.u32 %s1658_s29, 4  ;;  %s188_s23 = int_to_ptr.hbm [resolvable:$true] %s187_s23  ;;  %s190_s6 = int_to_ptr.vmem [resolvable:$true] %s189_s6 }
 0x2e1   :  { %s1424_s21 = sshra.s32 %s188_s23, 4  ;;  %s1425_s21 = int_to_ptr.hbm [resolvable:$true] %s1424_s21 }
 0x2e2   :  { %s1426_s30 = scalar_lea.hbm %s1425_s21, 1  ;;  %p1429_p6 = scmp.lt.s32.totalorder %s1425_s21, %s1933_s2 }
 0x2e3   :  { %p1427_p5 = scmp.ne.s32.totalorder %s1425_s21, %s1426_s30  ;;  %p1430_p7 = scmp.lt.s32.totalorder %s1836_s5, %s1426_s30 }
 0x2e5   :  { %p1431_p8 = por %p1430_p7, %p1429_p6 }
 0x2e7   :  { %p1432_p9 = pnand %p1431_p8, %p1427_p5 }
 0x2e9   :  { %1435 = shalt.err (!%p1432_p9)  }
 0x2ea   :  { %192 = dma.hbm_to_vmem [thread:$0]  %s188_s23, 16, %s190_s6, [#allocation3 + $0x1] }
 0x2eb   :  { %s194_s22 = scalar_lea.hbm %s1933_s2, %s1822_s0  ;;  %s1659_s27 = smov [#allocation2 + $0x2]  }
 0x2ec   :  { %s204_s26 = sshll.u32 %s194_s22, 4  ;;  %s206_s7 = sshll.u32 %s1659_s27, 4  ;;  %s205_s26 = int_to_ptr.hbm [resolvable:$true] %s204_s26  ;;  %s207_s7 = int_to_ptr.vmem [resolvable:$true] %s206_s7 }
 0x2ed   :  { %s1448_s28 = sshra.s32 %s205_s26, 4  ;;  %s1449_s28 = int_to_ptr.hbm [resolvable:$true] %s1448_s28 }
 0x2ee   :  { %s1450_s17 = scalar_lea.hbm %s1449_s28, 1  ;;  %p1453_p11 = scmp.lt.s32.totalorder %s1449_s28, %s1933_s2 }
 0x2ef   :  { %p1451_p10 = scmp.ne.s32.totalorder %s1449_s28, %s1450_s17  ;;  %p1454_p12 = scmp.lt.s32.totalorder %s1836_s5, %s1450_s17 }
 0x2f1   :  { %p1455_p13 = por %p1454_p12, %p1453_p11 }
 0x2f3   :  { %p1456_p0 = pnand %p1455_p13, %p1451_p10 }
 0x2f5   :  { %1459 = shalt.err (!%p1456_p0)  }
 0x2f6   :  { %209 = dma.hbm_to_vmem [thread:$0]  %s205_s26, 16, %s207_s7, [#allocation3 + $0x2] }
 0x2f7   :  { %s211_s4 = scalar_lea.hbm %s1933_s2, %s1824_s18  ;;  %s1660_s29 = smov [#allocation2 + $0x3]  }
 0x2f8   :  { %s221_s23 = sshll.u32 %s211_s4, 4  ;;  %s223_s6 = sshll.u32 %s1660_s29, 4  ;;  %s222_s23 = int_to_ptr.hbm [resolvable:$true] %s221_s23  ;;  %s224_s6 = int_to_ptr.vmem [resolvable:$true] %s223_s6 }
 0x2f9   :  { %s1472_s21 = sshra.s32 %s222_s23, 4  ;;  %s1473_s21 = int_to_ptr.hbm [resolvable:$true] %s1472_s21 }
 0x2fa   :  { %s1474_s30 = scalar_lea.hbm %s1473_s21, 1  ;;  %p1477_p2 = scmp.lt.s32.totalorder %s1473_s21, %s1933_s2 }
 0x2fb   :  { %p1475_p1 = scmp.ne.s32.totalorder %s1473_s21, %s1474_s30  ;;  %p1478_p3 = scmp.lt.s32.totalorder %s1836_s5, %s1474_s30 }
 0x2fd   :  { %p1479_p4 = por %p1478_p3, %p1477_p2 }
 0x2ff   :  { %p1480_p5 = pnand %p1479_p4, %p1475_p1 }
 0x301   :  { %1483 = shalt.err (!%p1480_p5)  }
 0x302   :  { %226 = dma.hbm_to_vmem [thread:$0]  %s222_s23, 16, %s224_s6, [#allocation3 + $0x3] }
 0x303   :  { %s228_s24 = scalar_lea.hbm %s1933_s2, %s1826_s1  ;;  %s1661_s26 = smov [#allocation2 + $0x4]  }
 0x304   :  { %s238_s22 = sshll.u32 %s228_s24, 4  ;;  %s240_s27 = sshll.u32 %s1661_s26, 4  ;;  %s239_s22 = int_to_ptr.hbm [resolvable:$true] %s238_s22  ;;  %s241_s27 = int_to_ptr.vmem [resolvable:$true] %s240_s27 }
 0x305   :  { %s1496_s7 = sshra.s32 %s239_s22, 4  ;;  %s1497_s7 = int_to_ptr.hbm [resolvable:$true] %s1496_s7 }
 0x306   :  { %s1498_s28 = scalar_lea.hbm %s1497_s7, 1  ;;  %p1501_p7 = scmp.lt.s32.totalorder %s1497_s7, %s1933_s2 }
 0x307   :  { %p1499_p6 = scmp.ne.s32.totalorder %s1497_s7, %s1498_s28  ;;  %p1502_p8 = scmp.lt.s32.totalorder %s1836_s5, %s1498_s28 }
 0x309   :  { %p1503_p9 = por %p1502_p8, %p1501_p7 }
 0x30b   :  { %p1504_p10 = pnand %p1503_p9, %p1499_p6 }
 0x30d   :  { %1507 = shalt.err (!%p1504_p10)  }
 0x30e   :  { %243 = dma.hbm_to_vmem [thread:$0]  %s239_s22, 16, %s241_s27, [#allocation3 + $0x4] }
 0x30f   :  { %s245_s0 = scalar_lea.hbm %s1933_s2, %s1828_s20  ;;  %s1662_s4 = smov [#allocation2 + $0x5]  }
 0x310   :  { %s255_s3 = sshll.u32 %s245_s0, 4  ;;  %s257_s23 = sshll.u32 %s1662_s4, 4  ;;  %s256_s3 = int_to_ptr.hbm [resolvable:$true] %s255_s3  ;;  %s258_s23 = int_to_ptr.vmem [resolvable:$true] %s257_s23 }
 0x311   :  { %s1520_s29 = sshra.s32 %s256_s3, 4  ;;  %s1521_s29 = int_to_ptr.hbm [resolvable:$true] %s1520_s29 }
 0x312   :  { %s1522_s6 = scalar_lea.hbm %s1521_s29, 1  ;;  %p1525_p12 = scmp.lt.s32.totalorder %s1521_s29, %s1933_s2 }
 0x313   :  { %p1523_p11 = scmp.ne.s32.totalorder %s1521_s29, %s1522_s6  ;;  %p1526_p13 = scmp.lt.s32.totalorder %s1836_s5, %s1522_s6 }
 0x315   :  { %p1527_p0 = por %p1526_p13, %p1525_p12 }
 0x317   :  { %p1528_p1 = pnand %p1527_p0, %p1523_p11 }
 0x319   :  { %1531 = shalt.err (!%p1528_p1)  }
 0x31a   :  { %260 = dma.hbm_to_vmem [thread:$0]  %s256_s3, 16, %s258_s23, [#allocation3 + $0x5] }
 0x31b   :  { %s1040_s19 = sld [smem:[#allocation4 + $0x6]]  ;;  %s1663_s25 = smov [#allocation2 + $0x6]  }
 0x31c   :  { %s1041_s20 = sld [smem:[#allocation4 + $0x7]]  ;;  %s274_s18 = sshll.u32 %s1663_s25, 4  ;;  %s275_s18 = int_to_ptr.vmem [resolvable:$true] %s274_s18 }
 0x31d   :  { %s1664_s8 = smov [#allocation2 + $0x7]  }
 0x31e   :  { %s1881_s24 = sshll.u32 %s1664_s8, 4  ;;  %s292_s24 = int_to_ptr.vmem [resolvable:$true] %s1881_s24 }
 0x321   :  { %s262_s27 = scalar_lea.hbm %s1933_s2, %s1040_s19 }
 0x322   :  { %s272_s7 = sshll.u32 %s262_s27, 4  ;;  %s279_s11 = scalar_lea.hbm %s1933_s2, %s1041_s20  ;;  %s273_s7 = int_to_ptr.hbm [resolvable:$true] %s272_s7 }
 0x323   :  { %s289_s1 = sshll.u32 %s279_s11, 4  ;;  %s1544_s13 = sshra.s32 %s273_s7, 4  ;;  %s1545_s13 = int_to_ptr.hbm [resolvable:$true] %s1544_s13  ;;  %s290_s1 = int_to_ptr.hbm [resolvable:$true] %s289_s1 }
 0x324   :  { %s1546_s0 = scalar_lea.hbm %s1545_s13, 1  ;;  %p1549_p3 = scmp.lt.s32.totalorder %s1545_s13, %s1933_s2 }
 0x325   :  { %p1547_p2 = scmp.ne.s32.totalorder %s1545_s13, %s1546_s0  ;;  %p1550_p4 = scmp.lt.s32.totalorder %s1836_s5, %s1546_s0 }
 0x327   :  { %p1551_p5 = por %p1550_p4, %p1549_p3 }
 0x329   :  { %p1552_p6 = pnand %p1551_p5, %p1547_p2 }
 0x32b   :  { %1555 = shalt.err (!%p1552_p6)  }
 0x32c   :  { %277 = dma.hbm_to_vmem [thread:$0]  %s273_s7, 16, %s275_s18, [#allocation3 + $0x6] }
 0x32d   :  { %s1568_s23 = sshra.s32 %s290_s1, 4  ;;  %s1569_s23 = int_to_ptr.hbm [resolvable:$true] %s1568_s23 }
 0x32e   :  { %s1570_s29 = scalar_lea.hbm %s1569_s23, 1  ;;  %p1573_p8 = scmp.lt.s32.totalorder %s1569_s23, %s1933_s2 }
 0x32f   :  { %p1571_p7 = scmp.ne.s32.totalorder %s1569_s23, %s1570_s29  ;;  %p1574_p9 = scmp.lt.s32.totalorder %s1836_s5, %s1570_s29 }
 0x331   :  { %p1575_p10 = por %p1574_p9, %p1573_p8 }
 0x333   :  { %p1576_p11 = pnand %p1575_p10, %p1571_p7 }
 0x335   :  { %1579 = shalt.err (!%p1576_p11)  }
 0x336   :  { %294 = dma.hbm_to_vmem [thread:$0]  %s290_s1, 16, %s292_s24, [#allocation3 + $0x7]  ;;  %v1218_v20 = vld [vmem:[%s1940_s9] ss:$0 sm:$0xff] }
 0x337   :  { %v1219_v22 = vld [vmem:[%s1941_s10] ss:$0 sm:$0xff] }
 0x34f   :  { %v662_v11 = vpop.xlane.xlu0 %661 }
 0x350   :  { %v663_v12 = vmul.f32 %v662_v11, %v1815_v6 }
 0x352   :  { %v664_v13 = vadd.f32 1e-05, %v663_v12 }
 0x354   :  { %1226 = vrsqrt.f32 %v664_v13  ;;  %vm671_vm12 = vweird.f32 %v664_v13 }
 0x35a   :  { %v1227_v14 = vpop.eup %1226 }
 0x35b   :  { %v666_v15 = vmul.f32 %v1227_v14, %v664_v13  ;;  %vm672_vm11 = vweird.f32 %v1227_v14 }
 0x35c   :  { %vm673_vm13 = vmor %vm671_vm12, %vm672_vm11 }
 0x35d   :  { %v667_v16 = vmul.f32 %v1227_v14, %v666_v15 }
 0x35f   :  { %v668_v17 = vmul.f32 0.5, %v667_v16 }
 0x361   :  { %v669_v18 = vsub.f32 1.5, %v668_v17 }
 0x363   :  { %v670_v19 = vmul.f32 %v1227_v14, %v669_v18 }
 0x365   :  { %v674_v21 = vsel %vm673_vm13, %v1227_v14, %v670_v19 }
 0x366   :  { %v675_v23 = vmul.f32 %v674_v21, %v1818_v9 }
 0x368   :  { %v679_v24 = vmul.f32 %v1218_v20, %v675_v23 }
 0x36a   :  { %v1906_v25 = vadd.f32 %v1219_v22, %v679_v24 }
 0x36b   :  { %1626 = dma.done.wait [#allocation3], 16 }
 0x36c   :  { %1627 = vsyncadd [#allocation3], 4294967280 }
 0x36d   :  { %1628 = dma.done.wait [#allocation3 + $0x1], 16 }
 0x36e   :  { %1629 = vsyncadd [#allocation3 + $0x1], 4294967280 }
 0x36f   :  { %1630 = dma.done.wait [#allocation3 + $0x2], 16 }
 0x370   :  { %1631 = vsyncadd [#allocation3 + $0x2], 4294967280 }
 0x371   :  { %1632 = dma.done.wait [#allocation3 + $0x3], 16 }
 0x372   :  { %1633 = vsyncadd [#allocation3 + $0x3], 4294967280 }
 0x373   :  { %1634 = dma.done.wait [#allocation3 + $0x4], 16 }
 0x374   :  { %1635 = vsyncadd [#allocation3 + $0x4], 4294967280 }
 0x375   :  { %1636 = dma.done.wait [#allocation3 + $0x5], 16 }
 0x376   :  { %1637 = vsyncadd [#allocation3 + $0x5], 4294967280 }
 0x377   :  { %1638 = dma.done.wait [#allocation3 + $0x6], 16 }
 0x378   :  { %1639 = vsyncadd [#allocation3 + $0x6], 4294967280 }
 0x379   :  { %1640 = dma.done.wait [#allocation3 + $0x7], 16 }
 0x37a   :  { %1641 = vsyncadd [#allocation3 + $0x7], 4294967280  ;;  %v1184_v26 = vld [vmem:[#allocation14 + $0x18] sm:$0xff]  ;;  %v1183_v28 = vld [vmem:[#allocation14 + $0x10] sm:$0xff]  ;;  %vm758_vm14 = vcmask 523264   ;;  %v878_v13 = vpack.c.bf16 %v1906_v25, %v1906_v25  ;;  %vm893_vm2 = vcmask 64512  }
 0x37b   :  { %v1192_v27 = vld [vmem:[#allocation15 + $0x38] sm:$0xff]  ;;  %766 = vmatpush.bf16.msra.mxu3 %v1184_v26  ;;  %v1182_v29 = vld [vmem:[#allocation14 + $0x8] sm:$0xff]  ;;  %v1181_v30 = vld [vmem:[#allocation14] sm:$0xff]  ;;  %s1954_s26 = sld [smem:[#allocation52_spill]]  ;;  %vm949_vm3 = vcmask 0  }
 0x37c   :  { %836 = vmatpush.bf16.msrb.mxu0 %v1192_v27  ;;  %v701_v31 = vld [vmem:[#allocation2] sm:$0xff]  ;;  %v1190_v34 = vld [vmem:[#allocation15 + $0x28] sm:$0xff]  ;;  %v1189_v35 = vld [vmem:[#allocation15 + $0x20] sm:$0xff]  ;;  %v925_v16 = vunpack.c.l.bf16 %v878_v13 }
 0x37d   :  { %v730_v32 = vpack.c.bf16 %v701_v31, %v701_v31  ;;  %v1191_v33 = vld [vmem:[#allocation15 + $0x30] sm:$0xff]  ;;  %v1188_v36 = vld [vmem:[#allocation15 + $0x18] sm:$0xff]  ;;  %v1186_v38 = vld [vmem:[#allocation15 + $0x8] sm:$0xff] }
 0x37e   :  { %v1187_v37 = vld [vmem:[#allocation15 + $0x10] sm:$0xff]  ;;  %v1185_v39 = vld [vmem:[#allocation15] sm:$0xff]  ;;  %v1228_v40 = vld [vmem:[%s1943_s12] ss:$0 sm:$0xff] }
 0x37f   :  { %767 = vmatpush.bf16.msra.mxu3 %v1183_v28  ;;  %v1229_v54 = vld [vmem:[%s1945_s14] ss:$0 sm:$0xff] }
 0x380   :  { %837 = vmatpush.bf16.msrb.mxu0 %v1191_v33  ;;  %v1230_v9 = vld [vmem:[%s1946_s15] ss:$0 sm:$0xff]  ;;  %s1665_s15 = smov [#allocation17]  }
 0x381   :  { %s958_s27 = sshll.u32 %s1954_s26, 4  ;;  %s959_s27 = int_to_ptr.hbm [resolvable:$true] %s958_s27 }
 0x383   :  { %768 = vmatpush.bf16.msra.mxu3 %v1182_v29 }
 0x384   :  { %838 = vmatpush.bf16.msrb.mxu0 %v1190_v34 }
 0x387   :  { %769 = vmatpush.bf16.msra.mxu3 %v1181_v30 }
 0x388   :  { %839 = vmatpush.bf16.msrb.mxu0 %v1189_v35 }
 0x38a   :  { %1124 = vmatmul.msk.bf16.vlgmr.msra.gmra.mxu3 %vm758_vm14, %v730_v32 }
 0x38c   :  { %840 = vmatpush.bf16.msrb.mxu0 %v1188_v36 }
 0x390   :  { %841 = vmatpush.bf16.msrb.mxu0 %v1187_v37 }
 0x394   :  { %842 = vmatpush.bf16.msrb.mxu0 %v1186_v38 }
 0x398   :  { %843 = vmatpush.bf16.msrb.mxu0 %v1185_v39 }
 0x40d   :  { %v771_v41 = vpop.f32.mrf.mxu3 }
 0x40e   :  { %v772_v42 = vadd.f32 %v1228_v40, %v771_v41 }
 0x410   :  { %v775_v43 = vmul.f32 %v772_v42, %v772_v42 }
 0x412   :  { %v776_v44 = vmul.f32 %v775_v43, %v772_v42 }
 0x414   :  { %v777_v45 = vmul.f32 0.044715, %v776_v44 }
 0x415   :  { %v773_v46 = vpop.f32.mrf.mxu3 }
 0x416   :  { %v778_v47 = vadd.f32 %v777_v45, %v772_v42 }
 0x418   :  { %v779_v48 = vmul.f32 0.7978846, %v778_v47 }
 0x41a   :  { %1232 = vtanh.f32 %v779_v48 }
 0x420   :  { %v1233_v49 = vpop.eup %1232 }
 0x421   :  { %v781_v50 = vadd.f32 1.0, %v1233_v49 }
 0x423   :  { %v782_v51 = vmul.f32 0.5, %v781_v50 }
 0x425   :  { %v783_v52 = vmul.f32 %v782_v51, %v772_v42 }
 0x427   :  { %v784_v53 = vpack.c.bf16 %v783_v52, %v783_v52 }
 0x429   :  { %844 = vmatmul.bf16.vlgmr.msrb.gmra.mxu0 %v784_v53 }
 0x4a6   :  { %v845_v55 = vpop.f32.mrf.mxu0 }
 0x4a7   :  { %v846_v56 = vadd.f32 %v1229_v54, %v845_v55 }
 0x4a9   :  { %v849_v57 = vadd.f32 %v846_v56, %v772_v42 }
 0x4ab   :  { %850 = vadd.xlane.f32.xlu0 %v849_v57 }
 0x4ae   :  { %v847_v58 = vpop.f32.mrf.mxu0 }
 0x51e   :  { %v851_v59 = vpop.xlane.xlu0 %850 }
 0x51f   :  { %v852_v60 = vmul.f32 %v851_v59, %v1815_v6 }
 0x521   :  { %v853_v61 = vsub.f32 %v849_v57, %v852_v60 }
 0x523   :  { %v854_v62 = vmul.f32 %v853_v61, %v853_v61 }
 0x525   :  { %855 = vadd.xlane.f32.xlu0 %v854_v62 }
 0x598   :  { %v856_v63 = vpop.xlane.xlu0 %855 }
 0x599   :  { %v857_v0 = vmul.f32 %v856_v63, %v1815_v6  ;;  %v1231_v6 = vld [vmem:[%s1947_s16] ss:$0 sm:$0xff]  ;;  %s956_s16 = sshll.u32 %s1665_s15, 4  ;;  %s957_s16 = int_to_ptr.vmem [resolvable:$true] %s956_s16 }
 0x59b   :  { %v858_v1 = vadd.f32 1e-05, %v857_v0 }
 0x59d   :  { %1234 = vrsqrt.f32 %v858_v1  ;;  %vm865_vm0 = vweird.f32 %v858_v1 }
 0x5a3   :  { %v1235_v2 = vpop.eup %1234 }
 0x5a4   :  { %v860_v3 = vmul.f32 %v1235_v2, %v858_v1  ;;  %vm866_vm15 = vweird.f32 %v1235_v2 }
 0x5a5   :  { %vm867_vm1 = vmor %vm865_vm0, %vm866_vm15 }
 0x5a6   :  { %v861_v4 = vmul.f32 %v1235_v2, %v860_v3 }
 0x5a8   :  { %v862_v5 = vmul.f32 0.5, %v861_v4 }
 0x5aa   :  { %v863_v7 = vsub.f32 1.5, %v862_v5 }
 0x5ac   :  { %v864_v8 = vmul.f32 %v1235_v2, %v863_v7 }
 0x5ae   :  { %v868_v10 = vsel %vm867_vm1, %v1235_v2, %v864_v8 }
 0x5af   :  { %v869_v11 = vmul.f32 %v868_v10, %v853_v61 }
 0x5b1   :  { %v873_v12 = vmul.f32 %v1230_v9, %v869_v11 }
 0x5b3   :  { %v877_v14 = vadd.f32 %v1231_v6, %v873_v12 }
 0x5b5   :  { %v879_v15 = vpack.c.bf16 %v877_v14, %v877_v14 }
 0x5b7   :  { %887 = vmatpush.bf16.xpose.msrb.mxu3 %v879_v15  ;;  %v926_v17 = vunpack.c.l.bf16 %v879_v15 }
 0x5b9   :  { %v927_v18 = vmul.f32 %v926_v17, %v925_v16 }
 0x5bb   :  { %928 = vadd.xlane.f32.xlu2 %v927_v18 }
 0x5be   :  { %888 = vmatmul.bf16.vlgmr.msrb.gmra.mxu3 %v878_v13 }
 0x62e   :  { %v929_v47 = vpop.xlane.xlu2 %928 }
 0x62f   :  { %v930_v48 = vrot.slane %v929_v47, 4 }
 0x631   :  { %v931_v50 = vadd.f32 %v930_v48, %v929_v47 }
 0x633   :  { %v932_v52 = vrot.slane %v931_v50, 2 }
 0x635   :  { %v933_v55 = vadd.f32 %v932_v52, %v931_v50 }
 0x637   :  { %v934_v58 = vrot.slane %v933_v55, 1 }
 0x639   :  { %v935_v61 = vadd.f32 %v934_v58, %v933_v55 }
 0x63b   :  { %v946_v1 = vmul.f32 2.0, %v935_v61 }
 0x641   :  { %v889_v19 = vpop.f32.mrf.mxu3 }
 0x642   :  { %v894_v20 = vsel %vm893_vm2, %v889_v19, -inf }
 0x643   :  { %895 = vmax.xlane.f32.xlu1 %v894_v20  ;;  %v906_v21 = vrot.slane %v894_v20, 4 }
 0x645   :  { %v907_v22 = vmax.f32 %v894_v20, %v906_v21 }
 0x647   :  { %v908_v23 = vrot.slane %v907_v22, 2 }
 0x649   :  { %v909_v24 = vmax.f32 %v907_v22, %v908_v23  ;;  %v891_v26 = vpop.f32.mrf.mxu3 }
 0x64b   :  { %v910_v27 = vrot.slane %v909_v24, 1 }
 0x64d   :  { %v911_v25 = vmax.f32 %v909_v24, %v910_v27 }
 0x64f   :  { %v912_v28 = vsub.f32 %v889_v19, %v911_v25 }
 0x651   :  { %v913_v29 = vmul.f32 1.442695, %v912_v28 }
 0x653   :  { %1236 = vpow2.f32 %v913_v29 }
 0x659   :  { %v1237_v30 = vpop.eup %1236 }
 0x65a   :  { %v915_v31 = vsel %vm893_vm2, %v1237_v30, 0.0 }
 0x65b   :  { %v916_v32 = vrot.slane %v915_v31, 4 }
 0x65d   :  { %v917_v33 = vadd.f32 %v916_v32, %v915_v31 }
 0x65f   :  { %v918_v34 = vrot.slane %v917_v33, 2 }
 0x661   :  { %v919_v35 = vadd.f32 %v918_v34, %v917_v33 }
 0x663   :  { %v920_v36 = vrot.slane %v919_v35, 1 }
 0x665   :  { %v921_v37 = vadd.f32 %v920_v36, %v919_v35 }
 0x667   :  { %1238 = vlog2.f32 %v921_v37 }
 0x66d   :  { %v1239_v38 = vpop.eup %1238 }
 0x66e   :  { %v923_v39 = vmul.f32 0.6931472, %v1239_v38 }
 0x670   :  { %v924_v40 = vadd.f32 %v923_v39, %v911_v25 }
 0x672   :  { %v942_v41 = vsel %vm893_vm2, %v924_v40, 0.0 }
 0x673   :  { %943 = vadd.xlane.f32.xlu2 %v942_v41 }
 0x6b6   :  { %v896_v42 = vpop.xlane.xlu1 %895 }
 0x6b7   :  { %v897_v43 = vsub.f32 %v889_v19, %v896_v42 }
 0x6b9   :  { %v898_v44 = vmul.f32 1.442695, %v897_v43 }
 0x6bb   :  { %1240 = vpow2.f32 %v898_v44 }
 0x6c1   :  { %v1241_v45 = vpop.eup %1240 }
 0x6c2   :  { %v900_v46 = vsel %vm893_vm2, %v1241_v45, 0.0 }
 0x6c3   :  { %901 = vadd.xlane.f32.xlu1 %v900_v46 }
 0x6e6   :  { %v944_v0 = vpop.xlane.xlu2 %943 }
 0x736   :  { %v902_v49 = vpop.xlane.xlu1 %901 }
 0x737   :  { %1242 = vlog2.f32 %v902_v49 }
 0x73d   :  { %v1243_v51 = vpop.eup %1242 }
 0x73e   :  { %v904_v53 = vmul.f32 0.6931472, %v1243_v51 }
 0x740   :  { %v905_v54 = vadd.f32 %v904_v53, %v896_v42 }
 0x742   :  { %v936_v56 = vrot.slane %v905_v54, 4 }
 0x744   :  { %v937_v57 = vadd.f32 %v936_v56, %v905_v54 }
 0x746   :  { %v938_v59 = vrot.slane %v937_v57, 2 }
 0x748   :  { %v939_v60 = vadd.f32 %v938_v59, %v937_v57 }
 0x74a   :  { %v940_v62 = vrot.slane %v939_v60, 1 }
 0x74c   :  { %v941_v63 = vadd.f32 %v940_v62, %v939_v60 }
 0x74e   :  { %v945_v2 = vadd.f32 %v944_v0, %v941_v63 }
 0x750   :  { %v947_v3 = vsub.f32 %v945_v2, %v946_v1 }
 0x752   :  { %v948_v4 = vmul.f32 0.0625, %v947_v3 }
 0x754   :  { %950 = vst.msk [vmem:[#allocation17] sm:$0x1] %vm949_vm3, %v948_v4 }
 0x755   :  { %961 = dma.vmem_to_hbm [thread:$0]  %s957_s16, 16, %s959_s27, [#allocation6]  }
 0x756   :  { %1642 = dma.done.wait [#allocation6], 16  }
 0x757   :  { %1643 = vsyncadd [#allocation6], 4294967280 }
 0x758   :  { %966 = vsyncpa [#allocation5], 1 }
 0x759   :  { %967 = vsyncpa [#allocation10], 1 }
 0x75a   :  { %968 = vsyncpa [#allocation13], 1 }
 0x75b   :  { %969 = vsyncpa [#allocation16], 1 }
 0x75c   :  { %970 = vsyncpa [#allocation6], 1 }
 0x75d   :  { %971 = vsyncpa [#allocation7], 1 }
 0x75e   :  { %972 = vsyncmov [#allocation3] }
 0x761   :  { %s973_s7 = vpop.sfrf %972 }
 0x762   :  { %p1157_p12 = scmp.ne.s32.totalorder %s973_s7, 0 }
 0x764   :  { %977 = shalt.err (%p1157_p12)  }
 0x765   :  { %979 = vsyncmov [#allocation3 + $0x1] }
 0x768   :  { %s980_s28 = vpop.sfrf %979 }
 0x769   :  { %p1158_p13 = scmp.ne.s32.totalorder %s980_s28, 0 }
 0x76b   :  { %984 = shalt.err (%p1158_p13)  }
 0x76c   :  { %986 = vsyncmov [#allocation3 + $0x2] }
 0x76f   :  { %s987_s17 = vpop.sfrf %986 }
 0x770   :  { %p1159_p0 = scmp.ne.s32.totalorder %s987_s17, 0 }
 0x772   :  { %991 = shalt.err (%p1159_p0)  }
 0x773   :  { %993 = vsyncmov [#allocation3 + $0x3] }
 0x776   :  { %s994_s11 = vpop.sfrf %993 }
 0x777   :  { %p1160_p1 = scmp.ne.s32.totalorder %s994_s11, 0 }
 0x779   :  { %998 = shalt.err (%p1160_p1)  }
 0x77a   :  { %1000 = vsyncmov [#allocation3 + $0x4] }
 0x77d   :  { %s1001_s1 = vpop.sfrf %1000 }
 0x77e   :  { %p1161_p2 = scmp.ne.s32.totalorder %s1001_s1, 0 }
 0x780   :  { %1005 = shalt.err (%p1161_p2)  }
 0x781   :  { %1007 = vsyncmov [#allocation3 + $0x5] }
 0x784   :  { %s1008_s13 = vpop.sfrf %1007 }
 0x785   :  { %p1162_p3 = scmp.ne.s32.totalorder %s1008_s13, 0 }
 0x787   :  { %1012 = shalt.err (%p1162_p3)  }
 0x788   :  { %1014 = vsyncmov [#allocation3 + $0x6] }
 0x78b   :  { %s1015_s0 = vpop.sfrf %1014 }
 0x78c   :  { %p1163_p4 = scmp.ne.s32.totalorder %s1015_s0, 0 }
 0x78e   :  { %1019 = shalt.err (%p1163_p4)  }
 0x78f   :  { %1021 = vsyncmov [#allocation3 + $0x7] }
 0x792   :  { %s1022_s3 = vpop.sfrf %1021 }
 0x793   :  { %p1164_p5 = scmp.ne.s32.totalorder %s1022_s3, 0 }
 0x795   :  { %1026 = shalt.err (%p1164_p5)  }

</bundles_post_ra>
